<compile_context>
chip_gen: v7x
topology: tpu7x:2x2x1
jax: 0.10.0
libtpu: 0.0.40
codegen_flags: <defaults>
</compile_context>

<pallas_src>
import math

import jax
import jax.numpy as jnp
from jax import lax
from jax.experimental import pallas as pl
from jax.experimental.pallas import tpu as pltpu

# ---------------- small synthetic BERT config ----------------
VOCAB = 100
HIDDEN = 32
N_LAYERS = 2
N_HEADS = 4
HEAD_DIM = HIDDEN // N_HEADS
INTER = 64
MAX_POS = 16
TYPE_VOCAB = 2
EPS = 1e-12          # BERT LayerNorm eps
BATCH = 2
SEQ = 8
CLS_PAD = 128        # lane-dense padded width for the CLS-head output
PACK_LANES = 128     # lane width of the packed small-parameter slabs


# ---------------- shared math helpers (in-kernel and reference) ----------------
def _layernorm(x, g, b):
    mu = jnp.mean(x, axis=-1, keepdims=True)
    var = jnp.mean(jnp.square(x - mu), axis=-1, keepdims=True)
    return (x - mu) * lax.rsqrt(var + EPS) * g + b


def _gelu(x):
    # exact (erf) GELU, matching HF BERT's "gelu"
    return 0.5 * x * (1.0 + lax.erf(x * (1.0 / math.sqrt(2.0))))


# ---------------- fused Pallas kernel (single invocation, no grid) ----------------
def fused_bert_kernel(x_ref, mask_ref, const_ref, clsw_ref,
                      wqkv_ref, wo_ref, wi_ref, wo2_ref, vec_ref,
                      feats_ref, logits_ref):
    # constant slab: row 0 = emb LN gamma, row 1 = emb LN beta, row 2 = cls bias
    const = const_ref[...]                              # (3, 128)
    emb_g = const[0:1, :HIDDEN]
    emb_b = const[1:2, :HIDDEN]
    cls_b = const[2:3, :]                               # (1, 128); only lane 0 used

    # embedding LayerNorm seeds the hidden state (stays in VMEM/vregs throughout)
    x = _layernorm(x_ref[...], emb_g, emb_b)            # (B*S, H)

    mb = mask_ref[...][:, None, :]                      # (B, 1, S) additive mask bias
    scale = 1.0 / math.sqrt(HEAD_DIM)

    for l in range(N_LAYERS):                           # static unroll; weights VMEM-resident
        vec = vec_ref[l]                                # (8, 128) packed small params
        bqkv = vec[0:1, :3 * HIDDEN]
        bo = vec[1:2, :HIDDEN]
        ln1g = vec[2:3, :HIDDEN]
        ln1b = vec[3:4, :HIDDEN]
        bi = vec[4:5, :INTER]
        bo2 = vec[5:6, :HIDDEN]
        ln2g = vec[6:7, :HIDDEN]
        ln2b = vec[7:8, :HIDDEN]

        # fused QKV projection: one MXU push instead of three
        qkv = jnp.dot(x, wqkv_ref[l], preferred_element_type=jnp.float32) + bqkv
        q = qkv[:, 0 * HIDDEN:1 * HIDDEN].reshape(BATCH, SEQ, HIDDEN)
        k = qkv[:, 1 * HIDDEN:2 * HIDDEN].reshape(BATCH, SEQ, HIDDEN)
        v = qkv[:, 2 * HIDDEN:3 * HIDDEN].reshape(BATCH, SEQ, HIDDEN)

        ctx_heads = []
        for head in range(N_HEADS):                     # tiny static loop, batched over B
            sl = slice(head * HEAD_DIM, (head + 1) * HEAD_DIM)
            qh, kh, vh = q[:, :, sl], k[:, :, sl], v[:, :, sl]   # (B, S, hd)
            s = jnp.einsum('bqd,bkd->bqk', qh, kh,
                           preferred_element_type=jnp.float32) * scale + mb
            s = s - jnp.max(s, axis=-1, keepdims=True)
            p = jnp.exp(s)
            p = p / jnp.sum(p, axis=-1, keepdims=True)  # exact division (matches reference)
            ctx_heads.append(jnp.einsum('bqk,bkd->bqd', p, vh,
                                        preferred_element_type=jnp.float32))
        ctx = jnp.concatenate(ctx_heads, axis=-1).reshape(BATCH * SEQ, HIDDEN)

        attn_out = jnp.dot(ctx, wo_ref[l], preferred_element_type=jnp.float32) + bo
        h1 = _layernorm(x + attn_out, ln1g, ln1b)

        ff = _gelu(jnp.dot(h1, wi_ref[l], preferred_element_type=jnp.float32) + bi)
        ff2 = jnp.dot(ff, wo2_ref[l], preferred_element_type=jnp.float32) + bo2
        x = _layernorm(h1 + ff2, ln2g, ln2b)

    # CLS pooling + Linear(H, 1) head into a lane-dense padded output
    feats = x.reshape(BATCH, SEQ, HIDDEN)[:, 0, :]       # (B, H) CLS tokens
    feats_ref[...] = feats
    logits_ref[...] = (jnp.dot(feats, clsw_ref[...],
                               preferred_element_type=jnp.float32) + cls_b)


# ---------------- pallas_call wrapper ----------------
def _full_spec(a):
    nd = a.ndim
    return pl.BlockSpec(tuple(a.shape), lambda *_, _nd=nd: (0,) * _nd)


def pallas_bert_encoder(x, maskbias, const_slab, cls_w_pad, stk):
    args = (x, maskbias, const_slab, cls_w_pad,
            stk['wqkv'], stk['wo'], stk['wi'], stk['wo2'], stk['vec'])
    in_specs = [_full_spec(a) for a in args]
    out_shape = (jax.ShapeDtypeStruct((BATCH, HIDDEN), jnp.float32),
                 jax.ShapeDtypeStruct((BATCH, CLS_PAD), jnp.float32))
    out_specs = (pl.BlockSpec((BATCH, HIDDEN), lambda *_: (0, 0)),
                 pl.BlockSpec((BATCH, CLS_PAD), lambda *_: (0, 0)))
    return pl.pallas_call(
        fused_bert_kernel,
        out_shape=out_shape,
        in_specs=in_specs,
        out_specs=out_specs,
        compiler_params=pltpu.CompilerParams(vmem_limit_bytes=16 * 1024 * 1024),
    )(*args)


# ---------------- parameters (deterministic synthetic init) ----------------
def init_params(key):
    keys = jax.random.split(key, 8 + N_LAYERS * 8)
    kit = iter(keys)

    def nrm(shape):
        return (0.02 * jax.random.normal(next(kit), shape)).astype(jnp.float32)

    params = {
        'word_emb': nrm((VOCAB, HIDDEN)),
        'pos_emb': nrm((MAX_POS, HIDDEN)),
        'type_emb': nrm((TYPE_VOCAB, HIDDEN)),
        'emb_ln_g': jnp.ones((1, HIDDEN), jnp.float32),
        'emb_ln_b': jnp.zeros((1, HIDDEN), jnp.float32),
        'cls_w': nrm((HIDDEN, 1)),
        'cls_b': jnp.zeros((1, 1), jnp.float32),
        'layers': [],
    }
    for _ in range(N_LAYERS):
        params['layers'].append({
            'wq': nrm((HIDDEN, HIDDEN)), 'bq': jnp.zeros((1, HIDDEN), jnp.float32),
            'wk': nrm((HIDDEN, HIDDEN)), 'bk': jnp.zeros((1, HIDDEN), jnp.float32),
            'wv': nrm((HIDDEN, HIDDEN)), 'bv': jnp.zeros((1, HIDDEN), jnp.float32),
            'wo': nrm((HIDDEN, HIDDEN)), 'bo': jnp.zeros((1, HIDDEN), jnp.float32),
            'ln1g': jnp.ones((1, HIDDEN), jnp.float32),
            'ln1b': jnp.zeros((1, HIDDEN), jnp.float32),
            'wi': nrm((HIDDEN, INTER)), 'bi': jnp.zeros((1, INTER), jnp.float32),
            'wo2': nrm((INTER, HIDDEN)), 'bo2': jnp.zeros((1, HIDDEN), jnp.float32),
            'ln2g': jnp.ones((1, HIDDEN), jnp.float32),
            'ln2b': jnp.zeros((1, HIDDEN), jnp.float32),
        })
    return params


def _pad_row(v):
    """(1, w) -> (1, PACK_LANES) zero-padded lane-dense row."""
    v2 = v.reshape(1, -1)
    return jnp.pad(v2, ((0, 0), (0, PACK_LANES - v2.shape[1])))


def build_fused_params(params):
    """Stack per-layer matrices along a leading layer axis; fuse QKV; pack all
    small vectors into lane-dense slabs; pad the CLS head to 128 lanes."""
    layers = params['layers']

    def stack(name):
        return jnp.stack([lw[name] for lw in layers], axis=0)

    vec = jnp.stack([
        jnp.concatenate([
            _pad_row(jnp.concatenate([lw['bq'], lw['bk'], lw['bv']], axis=1)),
            _pad_row(lw['bo']),
            _pad_row(lw['ln1g']), _pad_row(lw['ln1b']),
            _pad_row(lw['bi']), _pad_row(lw['bo2']),
            _pad_row(lw['ln2g']), _pad_row(lw['ln2b']),
        ], axis=0)
        for lw in layers], axis=0)                                  # (L, 8, 128)

    stk = {
        'wqkv': jnp.stack([jnp.concatenate([lw['wq'], lw['wk'], lw['wv']], axis=1)
                           for lw in layers], axis=0),              # (L, H, 3H)
        'wo': stack('wo'),                                          # (L, H, H)
        'wi': stack('wi'),                                          # (L, H, I)
        'wo2': stack('wo2'),                                        # (L, I, H)
        'vec': vec,                                                 # (L, 8, 128)
    }
    const_slab = jnp.concatenate([_pad_row(params['emb_ln_g']),
                                  _pad_row(params['emb_ln_b']),
                                  _pad_row(params['cls_b'])], axis=0)   # (3, 128)
    cls_w_pad = jnp.pad(params['cls_w'], ((0, 0), (0, CLS_PAD - 1)))    # (H, 128)
    return stk, const_slab, cls_w_pad


# ---------------- forward passes ----------------
def bert_forward_pallas(params, fused, input_ids, attention_mask, token_type_ids):
    stk, const_slab, cls_w_pad = fused
    B, S = input_ids.shape
    positions = jnp.arange(S)
    # TODO(synk): embedding row-gather stays in plain JAX (no clean tiled Pallas expression at these sizes).
    emb = (params['word_emb'][input_ids]
           + params['pos_emb'][positions][None, :, :]
           + params['type_emb'][token_type_ids])                  # (B, S, H)
    x = emb.reshape(B * S, HIDDEN).astype(jnp.float32)
    maskbias = (1.0 - attention_mask.astype(jnp.float32)) * -1e9  # (B, S)

    feats, logits_pad = pallas_bert_encoder(x, maskbias, const_slab, cls_w_pad, stk)
    logits = logits_pad[:, :1]                                    # nn.Linear(H, 1)
    return logits, feats


def bert_forward_ref(params, input_ids, attention_mask, token_type_ids):
    B, S = input_ids.shape
    positions = jnp.arange(S)
    emb = (params['word_emb'][input_ids]
           + params['pos_emb'][positions][None, :, :]
           + params['type_emb'][token_type_ids])
    x = _layernorm(emb.reshape(B * S, HIDDEN).astype(jnp.float32),
                   params['emb_ln_g'], params['emb_ln_b'])
    maskbias = (1.0 - attention_mask.astype(jnp.float32)) * -1e9
    scale = 1.0 / math.sqrt(HEAD_DIM)
    for lw in params['layers']:
        q = x @ lw['wq'] + lw['bq']
        k = x @ lw['wk'] + lw['bk']
        v = x @ lw['wv'] + lw['bv']
        q4 = q.reshape(B, S, N_HEADS, HEAD_DIM).transpose(0, 2, 1, 3)
        k4 = k.reshape(B, S, N_HEADS, HEAD_DIM).transpose(0, 2, 1, 3)
        v4 = v.reshape(B, S, N_HEADS, HEAD_DIM).transpose(0, 2, 1, 3)
        s = jnp.einsum('bhqd,bhkd->bhqk', q4, k4) * scale + maskbias[:, None, None, :]
        p = jax.nn.softmax(s, axis=-1)
        c = jnp.einsum('bhqk,bhkd->bhqd', p, v4).transpose(0, 2, 1, 3).reshape(B * S, HIDDEN)
        attn_out = c @ lw['wo'] + lw['bo']
        h1 = _layernorm(x + attn_out, lw['ln1g'], lw['ln1b'])
        ff = _gelu(h1 @ lw['wi'] + lw['bi']) @ lw['wo2'] + lw['bo2']
        x = _layernorm(h1 + ff, lw['ln2g'], lw['ln2b'])
    seq_out = x.reshape(B, S, HIDDEN)
    feats = seq_out[:, 0, :]
    logits = feats @ params['cls_w'] + params['cls_b']
    return logits, feats


if __name__ == "__main__":
    key = jax.random.PRNGKey(0)
    pkey, dkey = jax.random.split(key)
    params = init_params(pkey)
    fused = build_fused_params(params)

    k1, k2 = jax.random.split(dkey)
    ids = jnp.arange(BATCH, dtype=jnp.int32)                               # batch[0]
    input_ids = jax.random.randint(k1, (BATCH, SEQ), 0, VOCAB, jnp.int32)  # batch[1]
    attention_mask = jnp.ones((BATCH, SEQ), jnp.int32).at[1, 6:].set(0)    # batch[2]
    token_type_ids = jnp.concatenate(
        [jnp.zeros((BATCH, SEQ // 2), jnp.int32),
         jnp.ones((BATCH, SEQ // 2), jnp.int32)], axis=1)                  # batch[3]
    labels = jax.random.randint(k2, (BATCH,), 0, 2, jnp.int32)             # batch[4]

    logits, feats = bert_forward_pallas(params, fused, input_ids, attention_mask,
                                        token_type_ids)
    jax.block_until_ready((logits, feats))

    ref_logits, ref_feats = bert_forward_ref(params, input_ids, attention_mask,
                                             token_type_ids)
    assert logits.shape == (BATCH, 1) and feats.shape == (BATCH, HIDDEN)
    assert jnp.allclose(logits, ref_logits, atol=1e-4, rtol=1e-4)
    assert jnp.allclose(feats, ref_feats, atol=1e-4, rtol=1e-4)

    # module return contract: (ids, x, feats, labels)
    out = (ids, logits, feats, labels)
    print("KERNEL_OK")
</pallas_src>

<mosaic_0001>
module attributes {stable_mosaic.version = 11 : i64} {
  func.func @fused_bert_kernel(%arg0: memref<16x32xf32, #tpu.memory_space<vmem>>, %arg1: memref<2x8xf32, #tpu.memory_space<vmem>>, %arg2: memref<3x128xf32, #tpu.memory_space<vmem>>, %arg3: memref<32x128xf32, #tpu.memory_space<vmem>>, %arg4: memref<2x32x96xf32, #tpu.memory_space<vmem>>, %arg5: memref<2x32x32xf32, #tpu.memory_space<vmem>>, %arg6: memref<2x32x64xf32, #tpu.memory_space<vmem>>, %arg7: memref<2x64x32xf32, #tpu.memory_space<vmem>>, %arg8: memref<2x8x128xf32, #tpu.memory_space<vmem>>, %arg9: memref<2x32xf32, #tpu.memory_space<vmem>>, %arg10: memref<2x128xf32, #tpu.memory_space<vmem>>) attributes {dimension_semantics = [], scalar_prefetch = 0 : i64, scratch_operands = 0 : i64, tpu.core_type = #tpu.core_type<tc>} {
    %c0 = arith.constant 0 : index
    %c0_0 = arith.constant 0 : index
    %0 = vector.load %arg2[%c0, %c0_0] : memref<3x128xf32, #tpu.memory_space<vmem>>, vector<3x128xf32>
    %1 = vector.extract_strided_slice %0 {offsets = [0, 0], sizes = [1, 32], strides = [1, 1]} : vector<3x128xf32> to vector<1x32xf32>
    %2 = vector.extract_strided_slice %0 {offsets = [1, 0], sizes = [1, 32], strides = [1, 1]} : vector<3x128xf32> to vector<1x32xf32>
    %3 = vector.extract_strided_slice %0 {offsets = [2, 0], sizes = [1, 128], strides = [1, 1]} : vector<3x128xf32> to vector<1x128xf32>
    %c0_1 = arith.constant 0 : index
    %c0_2 = arith.constant 0 : index
    %4 = vector.load %arg0[%c0_1, %c0_2] : memref<16x32xf32, #tpu.memory_space<vmem>>, vector<16x32xf32>
    %cst = arith.constant dense<0.000000e+00> : vector<16xf32>
    %5 = vector.multi_reduction <add>, %4, %cst [1] : vector<16x32xf32> to vector<16xf32>
    %6 = vector.shape_cast %5 : vector<16xf32> to vector<16x1xf32>
    %cst_3 = arith.constant 3.200000e+01 : f32
    %7 = vector.broadcast %cst_3 : f32 to vector<16x1xf32>
    %8 = arith.divf %6, %7 : vector<16x1xf32>
    %9 = vector.broadcast %8 : vector<16x1xf32> to vector<16x32xf32>
    %10 = arith.subf %4, %9 : vector<16x32xf32>
    %11 = arith.mulf %10, %10 : vector<16x32xf32>
    %cst_4 = arith.constant dense<0.000000e+00> : vector<16xf32>
    %12 = vector.multi_reduction <add>, %11, %cst_4 [1] : vector<16x32xf32> to vector<16xf32>
    %13 = vector.shape_cast %12 : vector<16xf32> to vector<16x1xf32>
    %cst_5 = arith.constant 3.200000e+01 : f32
    %14 = vector.broadcast %cst_5 : f32 to vector<16x1xf32>
    %15 = arith.divf %13, %14 : vector<16x1xf32>
    %16 = vector.broadcast %8 : vector<16x1xf32> to vector<16x32xf32>
    %17 = arith.subf %4, %16 : vector<16x32xf32>
    %cst_6 = arith.constant 9.99999996E-13 : f32
    %18 = vector.broadcast %cst_6 : f32 to vector<16x1xf32>
    %19 = arith.addf %15, %18 : vector<16x1xf32>
    %20 = math.rsqrt %19 : vector<16x1xf32>
    %21 = vector.broadcast %20 : vector<16x1xf32> to vector<16x32xf32>
    %22 = arith.mulf %17, %21 : vector<16x32xf32>
    %23 = vector.broadcast %1 : vector<1x32xf32> to vector<16x32xf32>
    %24 = arith.mulf %22, %23 : vector<16x32xf32>
    %25 = vector.broadcast %2 : vector<1x32xf32> to vector<16x32xf32>
    %26 = arith.addf %24, %25 : vector<16x32xf32>
    %c0_7 = arith.constant 0 : index
    %c0_8 = arith.constant 0 : index
    %27 = vector.load %arg1[%c0_7, %c0_8] : memref<2x8xf32, #tpu.memory_space<vmem>>, vector<2x8xf32>
    %28 = vector.shape_cast %27 : vector<2x8xf32> to vector<2x1x8xf32>
    %c0_9 = arith.constant 0 : index
    %c0_10 = arith.constant 0 : index
    %c0_11 = arith.constant 0 : index
    %29 = vector.load %arg8[%c0_9, %c0_10, %c0_11] : memref<2x8x128xf32, #tpu.memory_space<vmem>>, vector<1x8x128xf32>
    %30 = vector.shape_cast %29 : vector<1x8x128xf32> to vector<8x128xf32>
    %31 = vector.extract_strided_slice %30 {offsets = [0, 0], sizes = [1, 96], strides = [1, 1]} : vector<8x128xf32> to vector<1x96xf32>
    %32 = vector.extract_strided_slice %30 {offsets = [1, 0], sizes = [1, 32], strides = [1, 1]} : vector<8x128xf32> to vector<1x32xf32>
    %33 = vector.extract_strided_slice %30 {offsets = [2, 0], sizes = [1, 32], strides = [1, 1]} : vector<8x128xf32> to vector<1x32xf32>
    %34 = vector.extract_strided_slice %30 {offsets = [3, 0], sizes = [1, 32], strides = [1, 1]} : vector<8x128xf32> to vector<1x32xf32>
    %35 = vector.extract_strided_slice %30 {offsets = [4, 0], sizes = [1, 64], strides = [1, 1]} : vector<8x128xf32> to vector<1x64xf32>
    %36 = vector.extract_strided_slice %30 {offsets = [5, 0], sizes = [1, 32], strides = [1, 1]} : vector<8x128xf32> to vector<1x32xf32>
    %37 = vector.extract_strided_slice %30 {offsets = [6, 0], sizes = [1, 32], strides = [1, 1]} : vector<8x128xf32> to vector<1x32xf32>
    %38 = vector.extract_strided_slice %30 {offsets = [7, 0], sizes = [1, 32], strides = [1, 1]} : vector<8x128xf32> to vector<1x32xf32>
    %c0_12 = arith.constant 0 : index
    %c0_13 = arith.constant 0 : index
    %c0_14 = arith.constant 0 : index
    %39 = vector.load %arg4[%c0_12, %c0_13, %c0_14] : memref<2x32x96xf32, #tpu.memory_space<vmem>>, vector<1x32x96xf32>
    %40 = vector.shape_cast %39 : vector<1x32x96xf32> to vector<32x96xf32>
    %cst_15 = arith.constant dense<0.000000e+00> : vector<16x96xf32>
    %41 = tpu.matmul %26, %40, %cst_15 {dimension_numbers = #tpu.dot_dimension_numbers<[1], [0], [0], [1], [0, 0, 1, 1], [], []>} : vector<16x32xf32>, vector<32x96xf32>, vector<16x96xf32> -> vector<16x96xf32>
    %42 = vector.broadcast %31 : vector<1x96xf32> to vector<16x96xf32>
    %43 = arith.addf %41, %42 : vector<16x96xf32>
    %44 = vector.extract_strided_slice %43 {offsets = [0, 0], sizes = [16, 32], strides = [1, 1]} : vector<16x96xf32> to vector<16x32xf32>
    %45 = vector.shape_cast %44 : vector<16x32xf32> to vector<2x8x32xf32>
    %46 = vector.extract_strided_slice %43 {offsets = [0, 32], sizes = [16, 32], strides = [1, 1]} : vector<16x96xf32> to vector<16x32xf32>
    %47 = vector.shape_cast %46 : vector<16x32xf32> to vector<2x8x32xf32>
    %48 = vector.extract_strided_slice %43 {offsets = [0, 64], sizes = [16, 32], strides = [1, 1]} : vector<16x96xf32> to vector<16x32xf32>
    %49 = vector.shape_cast %48 : vector<16x32xf32> to vector<2x8x32xf32>
    %50 = vector.extract_strided_slice %45 {offsets = [0, 0, 0], sizes = [2, 8, 8], strides = [1, 1, 1]} : vector<2x8x32xf32> to vector<2x8x8xf32>
    %51 = vector.extract_strided_slice %47 {offsets = [0, 0, 0], sizes = [2, 8, 8], strides = [1, 1, 1]} : vector<2x8x32xf32> to vector<2x8x8xf32>
    %52 = vector.extract_strided_slice %49 {offsets = [0, 0, 0], sizes = [2, 8, 8], strides = [1, 1, 1]} : vector<2x8x32xf32> to vector<2x8x8xf32>
    "tpu.trace_start"() <{level = 10 : i32, message = "bqd,bkd->bqk"}> : () -> ()
    %cst_16 = arith.constant dense<0.000000e+00> : vector<2x8x8xf32>
    %53 = tpu.matmul %50, %51, %cst_16 {dimension_numbers = #tpu.dot_dimension_numbers<[2], [2], [1], [1], [0, 0, 0, 1, 1, 1], [0], [0]>} : vector<2x8x8xf32>, vector<2x8x8xf32>, vector<2x8x8xf32> -> vector<2x8x8xf32>
    "tpu.trace_stop"() : () -> ()
    %cst_17 = arith.constant 0.353553385 : f32
    %54 = vector.broadcast %cst_17 : f32 to vector<2x8x8xf32>
    %55 = arith.mulf %53, %54 : vector<2x8x8xf32>
    %56 = vector.broadcast %28 : vector<2x1x8xf32> to vector<2x8x8xf32>
    %57 = arith.addf %55, %56 : vector<2x8x8xf32>
    %cst_18 = arith.constant dense<0xFF800000> : vector<2x8xf32>
    %58 = vector.multi_reduction <maximumf>, %57, %cst_18 [2] : vector<2x8x8xf32> to vector<2x8xf32>
    %59 = vector.shape_cast %58 : vector<2x8xf32> to vector<2x8x1xf32>
    %60 = vector.broadcast %59 : vector<2x8x1xf32> to vector<2x8x8xf32>
    %61 = arith.subf %57, %60 : vector<2x8x8xf32>
    %62 = math.exp %61 : vector<2x8x8xf32>
    %cst_19 = arith.constant dense<0.000000e+00> : vector<2x8xf32>
    %63 = vector.multi_reduction <add>, %62, %cst_19 [2] : vector<2x8x8xf32> to vector<2x8xf32>
    %64 = vector.shape_cast %63 : vector<2x8xf32> to vector<2x8x1xf32>
    %65 = vector.broadcast %64 : vector<2x8x1xf32> to vector<2x8x8xf32>
    %66 = arith.divf %62, %65 : vector<2x8x8xf32>
    "tpu.trace_start"() <{level = 10 : i32, message = "bqk,bkd->bqd"}> : () -> ()
    %cst_20 = arith.constant dense<0.000000e+00> : vector<2x8x8xf32>
    %67 = tpu.matmul %66, %52, %cst_20 {dimension_numbers = #tpu.dot_dimension_numbers<[2], [1], [1], [2], [0, 0, 0, 1, 1, 2], [0], [0]>} : vector<2x8x8xf32>, vector<2x8x8xf32>, vector<2x8x8xf32> -> vector<2x8x8xf32>
    "tpu.trace_stop"() : () -> ()
    %68 = vector.extract_strided_slice %45 {offsets = [0, 0, 8], sizes = [2, 8, 8], strides = [1, 1, 1]} : vector<2x8x32xf32> to vector<2x8x8xf32>
    %69 = vector.extract_strided_slice %47 {offsets = [0, 0, 8], sizes = [2, 8, 8], strides = [1, 1, 1]} : vector<2x8x32xf32> to vector<2x8x8xf32>
    %70 = vector.extract_strided_slice %49 {offsets = [0, 0, 8], sizes = [2, 8, 8], strides = [1, 1, 1]} : vector<2x8x32xf32> to vector<2x8x8xf32>
    "tpu.trace_start"() <{level = 10 : i32, message = "bqd,bkd->bqk"}> : () -> ()
    %cst_21 = arith.constant dense<0.000000e+00> : vector<2x8x8xf32>
    %71 = tpu.matmul %68, %69, %cst_21 {dimension_numbers = #tpu.dot_dimension_numbers<[2], [2], [1], [1], [0, 0, 0, 1, 1, 1], [0], [0]>} : vector<2x8x8xf32>, vector<2x8x8xf32>, vector<2x8x8xf32> -> vector<2x8x8xf32>
    "tpu.trace_stop"() : () -> ()
    %cst_22 = arith.constant 0.353553385 : f32
    %72 = vector.broadcast %cst_22 : f32 to vector<2x8x8xf32>
    %73 = arith.mulf %71, %72 : vector<2x8x8xf32>
    %74 = vector.broadcast %28 : vector<2x1x8xf32> to vector<2x8x8xf32>
    %75 = arith.addf %73, %74 : vector<2x8x8xf32>
    %cst_23 = arith.constant dense<0xFF800000> : vector<2x8xf32>
    %76 = vector.multi_reduction <maximumf>, %75, %cst_23 [2] : vector<2x8x8xf32> to vector<2x8xf32>
    %77 = vector.shape_cast %76 : vector<2x8xf32> to vector<2x8x1xf32>
    %78 = vector.broadcast %77 : vector<2x8x1xf32> to vector<2x8x8xf32>
    %79 = arith.subf %75, %78 : vector<2x8x8xf32>
    %80 = math.exp %79 : vector<2x8x8xf32>
    %cst_24 = arith.constant dense<0.000000e+00> : vector<2x8xf32>
    %81 = vector.multi_reduction <add>, %80, %cst_24 [2] : vector<2x8x8xf32> to vector<2x8xf32>
    %82 = vector.shape_cast %81 : vector<2x8xf32> to vector<2x8x1xf32>
    %83 = vector.broadcast %82 : vector<2x8x1xf32> to vector<2x8x8xf32>
    %84 = arith.divf %80, %83 : vector<2x8x8xf32>
    "tpu.trace_start"() <{level = 10 : i32, message = "bqk,bkd->bqd"}> : () -> ()
    %cst_25 = arith.constant dense<0.000000e+00> : vector<2x8x8xf32>
    %85 = tpu.matmul %84, %70, %cst_25 {dimension_numbers = #tpu.dot_dimension_numbers<[2], [1], [1], [2], [0, 0, 0, 1, 1, 2], [0], [0]>} : vector<2x8x8xf32>, vector<2x8x8xf32>, vector<2x8x8xf32> -> vector<2x8x8xf32>
    "tpu.trace_stop"() : () -> ()
    %86 = vector.extract_strided_slice %45 {offsets = [0, 0, 16], sizes = [2, 8, 8], strides = [1, 1, 1]} : vector<2x8x32xf32> to vector<2x8x8xf32>
    %87 = vector.extract_strided_slice %47 {offsets = [0, 0, 16], sizes = [2, 8, 8], strides = [1, 1, 1]} : vector<2x8x32xf32> to vector<2x8x8xf32>
    %88 = vector.extract_strided_slice %49 {offsets = [0, 0, 16], sizes = [2, 8, 8], strides = [1, 1, 1]} : vector<2x8x32xf32> to vector<2x8x8xf32>
    "tpu.trace_start"() <{level = 10 : i32, message = "bqd,bkd->bqk"}> : () -> ()
    %cst_26 = arith.constant dense<0.000000e+00> : vector<2x8x8xf32>
    %89 = tpu.matmul %86, %87, %cst_26 {dimension_numbers = #tpu.dot_dimension_numbers<[2], [2], [1], [1], [0, 0, 0, 1, 1, 1], [0], [0]>} : vector<2x8x8xf32>, vector<2x8x8xf32>, vector<2x8x8xf32> -> vector<2x8x8xf32>
    "tpu.trace_stop"() : () -> ()
    %cst_27 = arith.constant 0.353553385 : f32
    %90 = vector.broadcast %cst_27 : f32 to vector<2x8x8xf32>
    %91 = arith.mulf %89, %90 : vector<2x8x8xf32>
    %92 = vector.broadcast %28 : vector<2x1x8xf32> to vector<2x8x8xf32>
    %93 = arith.addf %91, %92 : vector<2x8x8xf32>
    %cst_28 = arith.constant dense<0xFF800000> : vector<2x8xf32>
    %94 = vector.multi_reduction <maximumf>, %93, %cst_28 [2] : vector<2x8x8xf32> to vector<2x8xf32>
    %95 = vector.shape_cast %94 : vector<2x8xf32> to vector<2x8x1xf32>
    %96 = vector.broadcast %95 : vector<2x8x1xf32> to vector<2x8x8xf32>
    %97 = arith.subf %93, %96 : vector<2x8x8xf32>
    %98 = math.exp %97 : vector<2x8x8xf32>
    %cst_29 = arith.constant dense<0.000000e+00> : vector<2x8xf32>
    %99 = vector.multi_reduction <add>, %98, %cst_29 [2] : vector<2x8x8xf32> to vector<2x8xf32>
    %100 = vector.shape_cast %99 : vector<2x8xf32> to vector<2x8x1xf32>
    %101 = vector.broadcast %100 : vector<2x8x1xf32> to vector<2x8x8xf32>
    %102 = arith.divf %98, %101 : vector<2x8x8xf32>
    "tpu.trace_start"() <{level = 10 : i32, message = "bqk,bkd->bqd"}> : () -> ()
    %cst_30 = arith.constant dense<0.000000e+00> : vector<2x8x8xf32>
    %103 = tpu.matmul %102, %88, %cst_30 {dimension_numbers = #tpu.dot_dimension_numbers<[2], [1], [1], [2], [0, 0, 0, 1, 1, 2], [0], [0]>} : vector<2x8x8xf32>, vector<2x8x8xf32>, vector<2x8x8xf32> -> vector<2x8x8xf32>
    "tpu.trace_stop"() : () -> ()
    %104 = vector.extract_strided_slice %45 {offsets = [0, 0, 24], sizes = [2, 8, 8], strides = [1, 1, 1]} : vector<2x8x32xf32> to vector<2x8x8xf32>
    %105 = vector.extract_strided_slice %47 {offsets = [0, 0, 24], sizes = [2, 8, 8], strides = [1, 1, 1]} : vector<2x8x32xf32> to vector<2x8x8xf32>
    %106 = vector.extract_strided_slice %49 {offsets = [0, 0, 24], sizes = [2, 8, 8], strides = [1, 1, 1]} : vector<2x8x32xf32> to vector<2x8x8xf32>
    "tpu.trace_start"() <{level = 10 : i32, message = "bqd,bkd->bqk"}> : () -> ()
    %cst_31 = arith.constant dense<0.000000e+00> : vector<2x8x8xf32>
    %107 = tpu.matmul %104, %105, %cst_31 {dimension_numbers = #tpu.dot_dimension_numbers<[2], [2], [1], [1], [0, 0, 0, 1, 1, 1], [0], [0]>} : vector<2x8x8xf32>, vector<2x8x8xf32>, vector<2x8x8xf32> -> vector<2x8x8xf32>
    "tpu.trace_stop"() : () -> ()
    %cst_32 = arith.constant 0.353553385 : f32
    %108 = vector.broadcast %cst_32 : f32 to vector<2x8x8xf32>
    %109 = arith.mulf %107, %108 : vector<2x8x8xf32>
    %110 = vector.broadcast %28 : vector<2x1x8xf32> to vector<2x8x8xf32>
    %111 = arith.addf %109, %110 : vector<2x8x8xf32>
    %cst_33 = arith.constant dense<0xFF800000> : vector<2x8xf32>
    %112 = vector.multi_reduction <maximumf>, %111, %cst_33 [2] : vector<2x8x8xf32> to vector<2x8xf32>
    %113 = vector.shape_cast %112 : vector<2x8xf32> to vector<2x8x1xf32>
    %114 = vector.broadcast %113 : vector<2x8x1xf32> to vector<2x8x8xf32>
    %115 = arith.subf %111, %114 : vector<2x8x8xf32>
    %116 = math.exp %115 : vector<2x8x8xf32>
    %cst_34 = arith.constant dense<0.000000e+00> : vector<2x8xf32>
    %117 = vector.multi_reduction <add>, %116, %cst_34 [2] : vector<2x8x8xf32> to vector<2x8xf32>
    %118 = vector.shape_cast %117 : vector<2x8xf32> to vector<2x8x1xf32>
    %119 = vector.broadcast %118 : vector<2x8x1xf32> to vector<2x8x8xf32>
    %120 = arith.divf %116, %119 : vector<2x8x8xf32>
    "tpu.trace_start"() <{level = 10 : i32, message = "bqk,bkd->bqd"}> : () -> ()
    %cst_35 = arith.constant dense<0.000000e+00> : vector<2x8x8xf32>
    %121 = tpu.matmul %120, %106, %cst_35 {dimension_numbers = #tpu.dot_dimension_numbers<[2], [1], [1], [2], [0, 0, 0, 1, 1, 2], [0], [0]>} : vector<2x8x8xf32>, vector<2x8x8xf32>, vector<2x8x8xf32> -> vector<2x8x8xf32>
    "tpu.trace_stop"() : () -> ()
    %122 = tpu.concatenate %67, %85, %103, %121 in 2 : vector<2x8x8xf32>, vector<2x8x8xf32>, vector<2x8x8xf32>, vector<2x8x8xf32> -> vector<2x8x32xf32>
    %123 = vector.shape_cast %122 : vector<2x8x32xf32> to vector<16x32xf32>
    %c0_36 = arith.constant 0 : index
    %c0_37 = arith.constant 0 : index
    %c0_38 = arith.constant 0 : index
    %124 = vector.load %arg5[%c0_36, %c0_37, %c0_38] : memref<2x32x32xf32, #tpu.memory_space<vmem>>, vector<1x32x32xf32>
    %125 = vector.shape_cast %124 : vector<1x32x32xf32> to vector<32x32xf32>
    %cst_39 = arith.constant dense<0.000000e+00> : vector<16x32xf32>
    %126 = tpu.matmul %123, %125, %cst_39 {dimension_numbers = #tpu.dot_dimension_numbers<[1], [0], [0], [1], [0, 0, 1, 1], [], []>} : vector<16x32xf32>, vector<32x32xf32>, vector<16x32xf32> -> vector<16x32xf32>
    %127 = vector.broadcast %32 : vector<1x32xf32> to vector<16x32xf32>
    %128 = arith.addf %126, %127 : vector<16x32xf32>
    %129 = arith.addf %26, %128 : vector<16x32xf32>
    %cst_40 = arith.constant dense<0.000000e+00> : vector<16xf32>
    %130 = vector.multi_reduction <add>, %129, %cst_40 [1] : vector<16x32xf32> to vector<16xf32>
    %131 = vector.shape_cast %130 : vector<16xf32> to vector<16x1xf32>
    %cst_41 = arith.constant 3.200000e+01 : f32
    %132 = vector.broadcast %cst_41 : f32 to vector<16x1xf32>
    %133 = arith.divf %131, %132 : vector<16x1xf32>
    %134 = vector.broadcast %133 : vector<16x1xf32> to vector<16x32xf32>
    %135 = arith.subf %129, %134 : vector<16x32xf32>
    %136 = arith.mulf %135, %135 : vector<16x32xf32>
    %cst_42 = arith.constant dense<0.000000e+00> : vector<16xf32>
    %137 = vector.multi_reduction <add>, %136, %cst_42 [1] : vector<16x32xf32> to vector<16xf32>
    %138 = vector.shape_cast %137 : vector<16xf32> to vector<16x1xf32>
    %cst_43 = arith.constant 3.200000e+01 : f32
    %139 = vector.broadcast %cst_43 : f32 to vector<16x1xf32>
    %140 = arith.divf %138, %139 : vector<16x1xf32>
    %141 = vector.broadcast %133 : vector<16x1xf32> to vector<16x32xf32>
    %142 = arith.subf %129, %141 : vector<16x32xf32>
    %cst_44 = arith.constant 9.99999996E-13 : f32
    %143 = vector.broadcast %cst_44 : f32 to vector<16x1xf32>
    %144 = arith.addf %140, %143 : vector<16x1xf32>
    %145 = math.rsqrt %144 : vector<16x1xf32>
    %146 = vector.broadcast %145 : vector<16x1xf32> to vector<16x32xf32>
    %147 = arith.mulf %142, %146 : vector<16x32xf32>
    %148 = vector.broadcast %33 : vector<1x32xf32> to vector<16x32xf32>
    %149 = arith.mulf %147, %148 : vector<16x32xf32>
    %150 = vector.broadcast %34 : vector<1x32xf32> to vector<16x32xf32>
    %151 = arith.addf %149, %150 : vector<16x32xf32>
    %c0_45 = arith.constant 0 : index
    %c0_46 = arith.constant 0 : index
    %c0_47 = arith.constant 0 : index
    %152 = vector.load %arg6[%c0_45, %c0_46, %c0_47] : memref<2x32x64xf32, #tpu.memory_space<vmem>>, vector<1x32x64xf32>
    %153 = vector.shape_cast %152 : vector<1x32x64xf32> to vector<32x64xf32>
    %cst_48 = arith.constant dense<0.000000e+00> : vector<16x64xf32>
    %154 = tpu.matmul %151, %153, %cst_48 {dimension_numbers = #tpu.dot_dimension_numbers<[1], [0], [0], [1], [0, 0, 1, 1], [], []>} : vector<16x32xf32>, vector<32x64xf32>, vector<16x64xf32> -> vector<16x64xf32>
    %155 = vector.broadcast %35 : vector<1x64xf32> to vector<16x64xf32>
    %156 = arith.addf %154, %155 : vector<16x64xf32>
    %cst_49 = arith.constant 5.000000e-01 : f32
    %157 = vector.broadcast %cst_49 : f32 to vector<16x64xf32>
    %158 = arith.mulf %157, %156 : vector<16x64xf32>
    %cst_50 = arith.constant 0.707106769 : f32
    %159 = vector.broadcast %cst_50 : f32 to vector<16x64xf32>
    %160 = arith.mulf %156, %159 : vector<16x64xf32>
    %161 = math.erf %160 : vector<16x64xf32>
    %cst_51 = arith.constant 1.000000e+00 : f32
    %162 = vector.broadcast %cst_51 : f32 to vector<16x64xf32>
    %163 = arith.addf %162, %161 : vector<16x64xf32>
    %164 = arith.mulf %158, %163 : vector<16x64xf32>
    %c0_52 = arith.constant 0 : index
    %c0_53 = arith.constant 0 : index
    %c0_54 = arith.constant 0 : index
    %165 = vector.load %arg7[%c0_52, %c0_53, %c0_54] : memref<2x64x32xf32, #tpu.memory_space<vmem>>, vector<1x64x32xf32>
    %166 = vector.shape_cast %165 : vector<1x64x32xf32> to vector<64x32xf32>
    %cst_55 = arith.constant dense<0.000000e+00> : vector<16x32xf32>
    %167 = tpu.matmul %164, %166, %cst_55 {dimension_numbers = #tpu.dot_dimension_numbers<[1], [0], [0], [1], [0, 0, 1, 1], [], []>} : vector<16x64xf32>, vector<64x32xf32>, vector<16x32xf32> -> vector<16x32xf32>
    %168 = vector.broadcast %36 : vector<1x32xf32> to vector<16x32xf32>
    %169 = arith.addf %167, %168 : vector<16x32xf32>
    %170 = arith.addf %151, %169 : vector<16x32xf32>
    %cst_56 = arith.constant dense<0.000000e+00> : vector<16xf32>
    %171 = vector.multi_reduction <add>, %170, %cst_56 [1] : vector<16x32xf32> to vector<16xf32>
    %172 = vector.shape_cast %171 : vector<16xf32> to vector<16x1xf32>
    %cst_57 = arith.constant 3.200000e+01 : f32
    %173 = vector.broadcast %cst_57 : f32 to vector<16x1xf32>
    %174 = arith.divf %172, %173 : vector<16x1xf32>
    %175 = vector.broadcast %174 : vector<16x1xf32> to vector<16x32xf32>
    %176 = arith.subf %170, %175 : vector<16x32xf32>
    %177 = arith.mulf %176, %176 : vector<16x32xf32>
    %cst_58 = arith.constant dense<0.000000e+00> : vector<16xf32>
    %178 = vector.multi_reduction <add>, %177, %cst_58 [1] : vector<16x32xf32> to vector<16xf32>
    %179 = vector.shape_cast %178 : vector<16xf32> to vector<16x1xf32>
    %cst_59 = arith.constant 3.200000e+01 : f32
    %180 = vector.broadcast %cst_59 : f32 to vector<16x1xf32>
    %181 = arith.divf %179, %180 : vector<16x1xf32>
    %182 = vector.broadcast %174 : vector<16x1xf32> to vector<16x32xf32>
    %183 = arith.subf %170, %182 : vector<16x32xf32>
    %cst_60 = arith.constant 9.99999996E-13 : f32
    %184 = vector.broadcast %cst_60 : f32 to vector<16x1xf32>
    %185 = arith.addf %181, %184 : vector<16x1xf32>
    %186 = math.rsqrt %185 : vector<16x1xf32>
    %187 = vector.broadcast %186 : vector<16x1xf32> to vector<16x32xf32>
    %188 = arith.mulf %183, %187 : vector<16x32xf32>
    %189 = vector.broadcast %37 : vector<1x32xf32> to vector<16x32xf32>
    %190 = arith.mulf %188, %189 : vector<16x32xf32>
    %191 = vector.broadcast %38 : vector<1x32xf32> to vector<16x32xf32>
    %192 = arith.addf %190, %191 : vector<16x32xf32>
    %c1 = arith.constant 1 : index
    %c0_61 = arith.constant 0 : index
    %c0_62 = arith.constant 0 : index
    %193 = vector.load %arg8[%c1, %c0_61, %c0_62] : memref<2x8x128xf32, #tpu.memory_space<vmem>>, vector<1x8x128xf32>
    %194 = vector.shape_cast %193 : vector<1x8x128xf32> to vector<8x128xf32>
    %195 = vector.extract_strided_slice %194 {offsets = [0, 0], sizes = [1, 96], strides = [1, 1]} : vector<8x128xf32> to vector<1x96xf32>
    %196 = vector.extract_strided_slice %194 {offsets = [1, 0], sizes = [1, 32], strides = [1, 1]} : vector<8x128xf32> to vector<1x32xf32>
    %197 = vector.extract_strided_slice %194 {offsets = [2, 0], sizes = [1, 32], strides = [1, 1]} : vector<8x128xf32> to vector<1x32xf32>
    %198 = vector.extract_strided_slice %194 {offsets = [3, 0], sizes = [1, 32], strides = [1, 1]} : vector<8x128xf32> to vector<1x32xf32>
    %199 = vector.extract_strided_slice %194 {offsets = [4, 0], sizes = [1, 64], strides = [1, 1]} : vector<8x128xf32> to vector<1x64xf32>
    %200 = vector.extract_strided_slice %194 {offsets = [5, 0], sizes = [1, 32], strides = [1, 1]} : vector<8x128xf32> to vector<1x32xf32>
    %201 = vector.extract_strided_slice %194 {offsets = [6, 0], sizes = [1, 32], strides = [1, 1]} : vector<8x128xf32> to vector<1x32xf32>
    %202 = vector.extract_strided_slice %194 {offsets = [7, 0], sizes = [1, 32], strides = [1, 1]} : vector<8x128xf32> to vector<1x32xf32>
    %c1_63 = arith.constant 1 : index
    %c0_64 = arith.constant 0 : index
    %c0_65 = arith.constant 0 : index
    %203 = vector.load %arg4[%c1_63, %c0_64, %c0_65] : memref<2x32x96xf32, #tpu.memory_space<vmem>>, vector<1x32x96xf32>
    %204 = vector.shape_cast %203 : vector<1x32x96xf32> to vector<32x96xf32>
    %cst_66 = arith.constant dense<0.000000e+00> : vector<16x96xf32>
    %205 = tpu.matmul %192, %204, %cst_66 {dimension_numbers = #tpu.dot_dimension_numbers<[1], [0], [0], [1], [0, 0, 1, 1], [], []>} : vector<16x32xf32>, vector<32x96xf32>, vector<16x96xf32> -> vector<16x96xf32>
    %206 = vector.broadcast %195 : vector<1x96xf32> to vector<16x96xf32>
    %207 = arith.addf %205, %206 : vector<16x96xf32>
    %208 = vector.extract_strided_slice %207 {offsets = [0, 0], sizes = [16, 32], strides = [1, 1]} : vector<16x96xf32> to vector<16x32xf32>
    %209 = vector.shape_cast %208 : vector<16x32xf32> to vector<2x8x32xf32>
    %210 = vector.extract_strided_slice %207 {offsets = [0, 32], sizes = [16, 32], strides = [1, 1]} : vector<16x96xf32> to vector<16x32xf32>
    %211 = vector.shape_cast %210 : vector<16x32xf32> to vector<2x8x32xf32>
    %212 = vector.extract_strided_slice %207 {offsets = [0, 64], sizes = [16, 32], strides = [1, 1]} : vector<16x96xf32> to vector<16x32xf32>
    %213 = vector.shape_cast %212 : vector<16x32xf32> to vector<2x8x32xf32>
    %214 = vector.extract_strided_slice %209 {offsets = [0, 0, 0], sizes = [2, 8, 8], strides = [1, 1, 1]} : vector<2x8x32xf32> to vector<2x8x8xf32>
    %215 = vector.extract_strided_slice %211 {offsets = [0, 0, 0], sizes = [2, 8, 8], strides = [1, 1, 1]} : vector<2x8x32xf32> to vector<2x8x8xf32>
    %216 = vector.extract_strided_slice %213 {offsets = [0, 0, 0], sizes = [2, 8, 8], strides = [1, 1, 1]} : vector<2x8x32xf32> to vector<2x8x8xf32>
    "tpu.trace_start"() <{level = 10 : i32, message = "bqd,bkd->bqk"}> : () -> ()
    %cst_67 = arith.constant dense<0.000000e+00> : vector<2x8x8xf32>
    %217 = tpu.matmul %214, %215, %cst_67 {dimension_numbers = #tpu.dot_dimension_numbers<[2], [2], [1], [1], [0, 0, 0, 1, 1, 1], [0], [0]>} : vector<2x8x8xf32>, vector<2x8x8xf32>, vector<2x8x8xf32> -> vector<2x8x8xf32>
    "tpu.trace_stop"() : () -> ()
    %cst_68 = arith.constant 0.353553385 : f32
    %218 = vector.broadcast %cst_68 : f32 to vector<2x8x8xf32>
    %219 = arith.mulf %217, %218 : vector<2x8x8xf32>
    %220 = vector.broadcast %28 : vector<2x1x8xf32> to vector<2x8x8xf32>
    %221 = arith.addf %219, %220 : vector<2x8x8xf32>
    %cst_69 = arith.constant dense<0xFF800000> : vector<2x8xf32>
    %222 = vector.multi_reduction <maximumf>, %221, %cst_69 [2] : vector<2x8x8xf32> to vector<2x8xf32>
    %223 = vector.shape_cast %222 : vector<2x8xf32> to vector<2x8x1xf32>
    %224 = vector.broadcast %223 : vector<2x8x1xf32> to vector<2x8x8xf32>
    %225 = arith.subf %221, %224 : vector<2x8x8xf32>
    %226 = math.exp %225 : vector<2x8x8xf32>
    %cst_70 = arith.constant dense<0.000000e+00> : vector<2x8xf32>
    %227 = vector.multi_reduction <add>, %226, %cst_70 [2] : vector<2x8x8xf32> to vector<2x8xf32>
    %228 = vector.shape_cast %227 : vector<2x8xf32> to vector<2x8x1xf32>
    %229 = vector.broadcast %228 : vector<2x8x1xf32> to vector<2x8x8xf32>
    %230 = arith.divf %226, %229 : vector<2x8x8xf32>
    "tpu.trace_start"() <{level = 10 : i32, message = "bqk,bkd->bqd"}> : () -> ()
    %cst_71 = arith.constant dense<0.000000e+00> : vector<2x8x8xf32>
    %231 = tpu.matmul %230, %216, %cst_71 {dimension_numbers = #tpu.dot_dimension_numbers<[2], [1], [1], [2], [0, 0, 0, 1, 1, 2], [0], [0]>} : vector<2x8x8xf32>, vector<2x8x8xf32>, vector<2x8x8xf32> -> vector<2x8x8xf32>
    "tpu.trace_stop"() : () -> ()
    %232 = vector.extract_strided_slice %209 {offsets = [0, 0, 8], sizes = [2, 8, 8], strides = [1, 1, 1]} : vector<2x8x32xf32> to vector<2x8x8xf32>
    %233 = vector.extract_strided_slice %211 {offsets = [0, 0, 8], sizes = [2, 8, 8], strides = [1, 1, 1]} : vector<2x8x32xf32> to vector<2x8x8xf32>
    %234 = vector.extract_strided_slice %213 {offsets = [0, 0, 8], sizes = [2, 8, 8], strides = [1, 1, 1]} : vector<2x8x32xf32> to vector<2x8x8xf32>
    "tpu.trace_start"() <{level = 10 : i32, message = "bqd,bkd->bqk"}> : () -> ()
    %cst_72 = arith.constant dense<0.000000e+00> : vector<2x8x8xf32>
    %235 = tpu.matmul %232, %233, %cst_72 {dimension_numbers = #tpu.dot_dimension_numbers<[2], [2], [1], [1], [0, 0, 0, 1, 1, 1], [0], [0]>} : vector<2x8x8xf32>, vector<2x8x8xf32>, vector<2x8x8xf32> -> vector<2x8x8xf32>
    "tpu.trace_stop"() : () -> ()
    %cst_73 = arith.constant 0.353553385 : f32
    %236 = vector.broadcast %cst_73 : f32 to vector<2x8x8xf32>
    %237 = arith.mulf %235, %236 : vector<2x8x8xf32>
    %238 = vector.broadcast %28 : vector<2x1x8xf32> to vector<2x8x8xf32>
    %239 = arith.addf %237, %238 : vector<2x8x8xf32>
    %cst_74 = arith.constant dense<0xFF800000> : vector<2x8xf32>
    %240 = vector.multi_reduction <maximumf>, %239, %cst_74 [2] : vector<2x8x8xf32> to vector<2x8xf32>
    %241 = vector.shape_cast %240 : vector<2x8xf32> to vector<2x8x1xf32>
    %242 = vector.broadcast %241 : vector<2x8x1xf32> to vector<2x8x8xf32>
    %243 = arith.subf %239, %242 : vector<2x8x8xf32>
    %244 = math.exp %243 : vector<2x8x8xf32>
    %cst_75 = arith.constant dense<0.000000e+00> : vector<2x8xf32>
    %245 = vector.multi_reduction <add>, %244, %cst_75 [2] : vector<2x8x8xf32> to vector<2x8xf32>
    %246 = vector.shape_cast %245 : vector<2x8xf32> to vector<2x8x1xf32>
    %247 = vector.broadcast %246 : vector<2x8x1xf32> to vector<2x8x8xf32>
    %248 = arith.divf %244, %247 : vector<2x8x8xf32>
    "tpu.trace_start"() <{level = 10 : i32, message = "bqk,bkd->bqd"}> : () -> ()
    %cst_76 = arith.constant dense<0.000000e+00> : vector<2x8x8xf32>
    %249 = tpu.matmul %248, %234, %cst_76 {dimension_numbers = #tpu.dot_dimension_numbers<[2], [1], [1], [2], [0, 0, 0, 1, 1, 2], [0], [0]>} : vector<2x8x8xf32>, vector<2x8x8xf32>, vector<2x8x8xf32> -> vector<2x8x8xf32>
    "tpu.trace_stop"() : () -> ()
    %250 = vector.extract_strided_slice %209 {offsets = [0, 0, 16], sizes = [2, 8, 8], strides = [1, 1, 1]} : vector<2x8x32xf32> to vector<2x8x8xf32>
    %251 = vector.extract_strided_slice %211 {offsets = [0, 0, 16], sizes = [2, 8, 8], strides = [1, 1, 1]} : vector<2x8x32xf32> to vector<2x8x8xf32>
    %252 = vector.extract_strided_slice %213 {offsets = [0, 0, 16], sizes = [2, 8, 8], strides = [1, 1, 1]} : vector<2x8x32xf32> to vector<2x8x8xf32>
    "tpu.trace_start"() <{level = 10 : i32, message = "bqd,bkd->bqk"}> : () -> ()
    %cst_77 = arith.constant dense<0.000000e+00> : vector<2x8x8xf32>
    %253 = tpu.matmul %250, %251, %cst_77 {dimension_numbers = #tpu.dot_dimension_numbers<[2], [2], [1], [1], [0, 0, 0, 1, 1, 1], [0], [0]>} : vector<2x8x8xf32>, vector<2x8x8xf32>, vector<2x8x8xf32> -> vector<2x8x8xf32>
    "tpu.trace_stop"() : () -> ()
    %cst_78 = arith.constant 0.353553385 : f32
    %254 = vector.broadcast %cst_78 : f32 to vector<2x8x8xf32>
    %255 = arith.mulf %253, %254 : vector<2x8x8xf32>
    %256 = vector.broadcast %28 : vector<2x1x8xf32> to vector<2x8x8xf32>
    %257 = arith.addf %255, %256 : vector<2x8x8xf32>
    %cst_79 = arith.constant dense<0xFF800000> : vector<2x8xf32>
    %258 = vector.multi_reduction <maximumf>, %257, %cst_79 [2] : vector<2x8x8xf32> to vector<2x8xf32>
    %259 = vector.shape_cast %258 : vector<2x8xf32> to vector<2x8x1xf32>
    %260 = vector.broadcast %259 : vector<2x8x1xf32> to vector<2x8x8xf32>
    %261 = arith.subf %257, %260 : vector<2x8x8xf32>
    %262 = math.exp %261 : vector<2x8x8xf32>
    %cst_80 = arith.constant dense<0.000000e+00> : vector<2x8xf32>
    %263 = vector.multi_reduction <add>, %262, %cst_80 [2] : vector<2x8x8xf32> to vector<2x8xf32>
    %264 = vector.shape_cast %263 : vector<2x8xf32> to vector<2x8x1xf32>
    %265 = vector.broadcast %264 : vector<2x8x1xf32> to vector<2x8x8xf32>
    %266 = arith.divf %262, %265 : vector<2x8x8xf32>
    "tpu.trace_start"() <{level = 10 : i32, message = "bqk,bkd->bqd"}> : () -> ()
    %cst_81 = arith.constant dense<0.000000e+00> : vector<2x8x8xf32>
    %267 = tpu.matmul %266, %252, %cst_81 {dimension_numbers = #tpu.dot_dimension_numbers<[2], [1], [1], [2], [0, 0, 0, 1, 1, 2], [0], [0]>} : vector<2x8x8xf32>, vector<2x8x8xf32>, vector<2x8x8xf32> -> vector<2x8x8xf32>
    "tpu.trace_stop"() : () -> ()
    %268 = vector.extract_strided_slice %209 {offsets = [0, 0, 24], sizes = [2, 8, 8], strides = [1, 1, 1]} : vector<2x8x32xf32> to vector<2x8x8xf32>
    %269 = vector.extract_strided_slice %211 {offsets = [0, 0, 24], sizes = [2, 8, 8], strides = [1, 1, 1]} : vector<2x8x32xf32> to vector<2x8x8xf32>
    %270 = vector.extract_strided_slice %213 {offsets = [0, 0, 24], sizes = [2, 8, 8], strides = [1, 1, 1]} : vector<2x8x32xf32> to vector<2x8x8xf32>
    "tpu.trace_start"() <{level = 10 : i32, message = "bqd,bkd->bqk"}> : () -> ()
    %cst_82 = arith.constant dense<0.000000e+00> : vector<2x8x8xf32>
    %271 = tpu.matmul %268, %269, %cst_82 {dimension_numbers = #tpu.dot_dimension_numbers<[2], [2], [1], [1], [0, 0, 0, 1, 1, 1], [0], [0]>} : vector<2x8x8xf32>, vector<2x8x8xf32>, vector<2x8x8xf32> -> vector<2x8x8xf32>
    "tpu.trace_stop"() : () -> ()
    %cst_83 = arith.constant 0.353553385 : f32
    %272 = vector.broadcast %cst_83 : f32 to vector<2x8x8xf32>
    %273 = arith.mulf %271, %272 : vector<2x8x8xf32>
    %274 = vector.broadcast %28 : vector<2x1x8xf32> to vector<2x8x8xf32>
    %275 = arith.addf %273, %274 : vector<2x8x8xf32>
    %cst_84 = arith.constant dense<0xFF800000> : vector<2x8xf32>
    %276 = vector.multi_reduction <maximumf>, %275, %cst_84 [2] : vector<2x8x8xf32> to vector<2x8xf32>
    %277 = vector.shape_cast %276 : vector<2x8xf32> to vector<2x8x1xf32>
    %278 = vector.broadcast %277 : vector<2x8x1xf32> to vector<2x8x8xf32>
    %279 = arith.subf %275, %278 : vector<2x8x8xf32>
    %280 = math.exp %279 : vector<2x8x8xf32>
    %cst_85 = arith.constant dense<0.000000e+00> : vector<2x8xf32>
    %281 = vector.multi_reduction <add>, %280, %cst_85 [2] : vector<2x8x8xf32> to vector<2x8xf32>
    %282 = vector.shape_cast %281 : vector<2x8xf32> to vector<2x8x1xf32>
    %283 = vector.broadcast %282 : vector<2x8x1xf32> to vector<2x8x8xf32>
    %284 = arith.divf %280, %283 : vector<2x8x8xf32>
    "tpu.trace_start"() <{level = 10 : i32, message = "bqk,bkd->bqd"}> : () -> ()
    %cst_86 = arith.constant dense<0.000000e+00> : vector<2x8x8xf32>
    %285 = tpu.matmul %284, %270, %cst_86 {dimension_numbers = #tpu.dot_dimension_numbers<[2], [1], [1], [2], [0, 0, 0, 1, 1, 2], [0], [0]>} : vector<2x8x8xf32>, vector<2x8x8xf32>, vector<2x8x8xf32> -> vector<2x8x8xf32>
    "tpu.trace_stop"() : () -> ()
    %286 = tpu.concatenate %231, %249, %267, %285 in 2 : vector<2x8x8xf32>, vector<2x8x8xf32>, vector<2x8x8xf32>, vector<2x8x8xf32> -> vector<2x8x32xf32>
    %287 = vector.shape_cast %286 : vector<2x8x32xf32> to vector<16x32xf32>
    %c1_87 = arith.constant 1 : index
    %c0_88 = arith.constant 0 : index
    %c0_89 = arith.constant 0 : index
    %288 = vector.load %arg5[%c1_87, %c0_88, %c0_89] : memref<2x32x32xf32, #tpu.memory_space<vmem>>, vector<1x32x32xf32>
    %289 = vector.shape_cast %288 : vector<1x32x32xf32> to vector<32x32xf32>
    %cst_90 = arith.constant dense<0.000000e+00> : vector<16x32xf32>
    %290 = tpu.matmul %287, %289, %cst_90 {dimension_numbers = #tpu.dot_dimension_numbers<[1], [0], [0], [1], [0, 0, 1, 1], [], []>} : vector<16x32xf32>, vector<32x32xf32>, vector<16x32xf32> -> vector<16x32xf32>
    %291 = vector.broadcast %196 : vector<1x32xf32> to vector<16x32xf32>
    %292 = arith.addf %290, %291 : vector<16x32xf32>
    %293 = arith.addf %192, %292 : vector<16x32xf32>
    %cst_91 = arith.constant dense<0.000000e+00> : vector<16xf32>
    %294 = vector.multi_reduction <add>, %293, %cst_91 [1] : vector<16x32xf32> to vector<16xf32>
    %295 = vector.shape_cast %294 : vector<16xf32> to vector<16x1xf32>
    %cst_92 = arith.constant 3.200000e+01 : f32
    %296 = vector.broadcast %cst_92 : f32 to vector<16x1xf32>
    %297 = arith.divf %295, %296 : vector<16x1xf32>
    %298 = vector.broadcast %297 : vector<16x1xf32> to vector<16x32xf32>
    %299 = arith.subf %293, %298 : vector<16x32xf32>
    %300 = arith.mulf %299, %299 : vector<16x32xf32>
    %cst_93 = arith.constant dense<0.000000e+00> : vector<16xf32>
    %301 = vector.multi_reduction <add>, %300, %cst_93 [1] : vector<16x32xf32> to vector<16xf32>
    %302 = vector.shape_cast %301 : vector<16xf32> to vector<16x1xf32>
    %cst_94 = arith.constant 3.200000e+01 : f32
    %303 = vector.broadcast %cst_94 : f32 to vector<16x1xf32>
    %304 = arith.divf %302, %303 : vector<16x1xf32>
    %305 = vector.broadcast %297 : vector<16x1xf32> to vector<16x32xf32>
    %306 = arith.subf %293, %305 : vector<16x32xf32>
    %cst_95 = arith.constant 9.99999996E-13 : f32
    %307 = vector.broadcast %cst_95 : f32 to vector<16x1xf32>
    %308 = arith.addf %304, %307 : vector<16x1xf32>
    %309 = math.rsqrt %308 : vector<16x1xf32>
    %310 = vector.broadcast %309 : vector<16x1xf32> to vector<16x32xf32>
    %311 = arith.mulf %306, %310 : vector<16x32xf32>
    %312 = vector.broadcast %197 : vector<1x32xf32> to vector<16x32xf32>
    %313 = arith.mulf %311, %312 : vector<16x32xf32>
    %314 = vector.broadcast %198 : vector<1x32xf32> to vector<16x32xf32>
    %315 = arith.addf %313, %314 : vector<16x32xf32>
    %c1_96 = arith.constant 1 : index
    %c0_97 = arith.constant 0 : index
    %c0_98 = arith.constant 0 : index
    %316 = vector.load %arg6[%c1_96, %c0_97, %c0_98] : memref<2x32x64xf32, #tpu.memory_space<vmem>>, vector<1x32x64xf32>
    %317 = vector.shape_cast %316 : vector<1x32x64xf32> to vector<32x64xf32>
    %cst_99 = arith.constant dense<0.000000e+00> : vector<16x64xf32>
    %318 = tpu.matmul %315, %317, %cst_99 {dimension_numbers = #tpu.dot_dimension_numbers<[1], [0], [0], [1], [0, 0, 1, 1], [], []>} : vector<16x32xf32>, vector<32x64xf32>, vector<16x64xf32> -> vector<16x64xf32>
    %319 = vector.broadcast %199 : vector<1x64xf32> to vector<16x64xf32>
    %320 = arith.addf %318, %319 : vector<16x64xf32>
    %cst_100 = arith.constant 5.000000e-01 : f32
    %321 = vector.broadcast %cst_100 : f32 to vector<16x64xf32>
    %322 = arith.mulf %321, %320 : vector<16x64xf32>
    %cst_101 = arith.constant 0.707106769 : f32
    %323 = vector.broadcast %cst_101 : f32 to vector<16x64xf32>
    %324 = arith.mulf %320, %323 : vector<16x64xf32>
    %325 = math.erf %324 : vector<16x64xf32>
    %cst_102 = arith.constant 1.000000e+00 : f32
    %326 = vector.broadcast %cst_102 : f32 to vector<16x64xf32>
    %327 = arith.addf %326, %325 : vector<16x64xf32>
    %328 = arith.mulf %322, %327 : vector<16x64xf32>
    %c1_103 = arith.constant 1 : index
    %c0_104 = arith.constant 0 : index
    %c0_105 = arith.constant 0 : index
    %329 = vector.load %arg7[%c1_103, %c0_104, %c0_105] : memref<2x64x32xf32, #tpu.memory_space<vmem>>, vector<1x64x32xf32>
    %330 = vector.shape_cast %329 : vector<1x64x32xf32> to vector<64x32xf32>
    %cst_106 = arith.constant dense<0.000000e+00> : vector<16x32xf32>
    %331 = tpu.matmul %328, %330, %cst_106 {dimension_numbers = #tpu.dot_dimension_numbers<[1], [0], [0], [1], [0, 0, 1, 1], [], []>} : vector<16x64xf32>, vector<64x32xf32>, vector<16x32xf32> -> vector<16x32xf32>
    %332 = vector.broadcast %200 : vector<1x32xf32> to vector<16x32xf32>
    %333 = arith.addf %331, %332 : vector<16x32xf32>
    %334 = arith.addf %315, %333 : vector<16x32xf32>
    %cst_107 = arith.constant dense<0.000000e+00> : vector<16xf32>
    %335 = vector.multi_reduction <add>, %334, %cst_107 [1] : vector<16x32xf32> to vector<16xf32>
    %336 = vector.shape_cast %335 : vector<16xf32> to vector<16x1xf32>
    %cst_108 = arith.constant 3.200000e+01 : f32
    %337 = vector.broadcast %cst_108 : f32 to vector<16x1xf32>
    %338 = arith.divf %336, %337 : vector<16x1xf32>
    %339 = vector.broadcast %338 : vector<16x1xf32> to vector<16x32xf32>
    %340 = arith.subf %334, %339 : vector<16x32xf32>
    %341 = arith.mulf %340, %340 : vector<16x32xf32>
    %cst_109 = arith.constant dense<0.000000e+00> : vector<16xf32>
    %342 = vector.multi_reduction <add>, %341, %cst_109 [1] : vector<16x32xf32> to vector<16xf32>
    %343 = vector.shape_cast %342 : vector<16xf32> to vector<16x1xf32>
    %cst_110 = arith.constant 3.200000e+01 : f32
    %344 = vector.broadcast %cst_110 : f32 to vector<16x1xf32>
    %345 = arith.divf %343, %344 : vector<16x1xf32>
    %346 = vector.broadcast %338 : vector<16x1xf32> to vector<16x32xf32>
    %347 = arith.subf %334, %346 : vector<16x32xf32>
    %cst_111 = arith.constant 9.99999996E-13 : f32
    %348 = vector.broadcast %cst_111 : f32 to vector<16x1xf32>
    %349 = arith.addf %345, %348 : vector<16x1xf32>
    %350 = math.rsqrt %349 : vector<16x1xf32>
    %351 = vector.broadcast %350 : vector<16x1xf32> to vector<16x32xf32>
    %352 = arith.mulf %347, %351 : vector<16x32xf32>
    %353 = vector.broadcast %201 : vector<1x32xf32> to vector<16x32xf32>
    %354 = arith.mulf %352, %353 : vector<16x32xf32>
    %355 = vector.broadcast %202 : vector<1x32xf32> to vector<16x32xf32>
    %356 = arith.addf %354, %355 : vector<16x32xf32>
    %357 = vector.shape_cast %356 : vector<16x32xf32> to vector<2x8x32xf32>
    %358 = vector.extract_strided_slice %357 {offsets = [0, 0, 0], sizes = [2, 1, 32], strides = [1, 1, 1]} : vector<2x8x32xf32> to vector<2x1x32xf32>
    %359 = vector.shape_cast %358 : vector<2x1x32xf32> to vector<2x32xf32>
    %c0_112 = arith.constant 0 : index
    %c0_113 = arith.constant 0 : index
    %360 = vector.load %arg9[%c0_112, %c0_113] : memref<2x32xf32, #tpu.memory_space<vmem>>, vector<2x32xf32>
    tpu.vector_store %arg9[%c0_112, %c0_113], %359 {strides = array<i32>} : memref<2x32xf32, #tpu.memory_space<vmem>>, vector<2x32xf32>,
    %c0_114 = arith.constant 0 : index
    %c0_115 = arith.constant 0 : index
    %361 = vector.load %arg3[%c0_114, %c0_115] : memref<32x128xf32, #tpu.memory_space<vmem>>, vector<32x128xf32>
    %cst_116 = arith.constant dense<0.000000e+00> : vector<2x128xf32>
    %362 = tpu.matmul %359, %361, %cst_116 {dimension_numbers = #tpu.dot_dimension_numbers<[1], [0], [0], [1], [0, 0, 1, 1], [], []>} : vector<2x32xf32>, vector<32x128xf32>, vector<2x128xf32> -> vector<2x128xf32>
    %363 = vector.broadcast %3 : vector<1x128xf32> to vector<2x128xf32>
    %364 = arith.addf %362, %363 : vector<2x128xf32>
    %c0_117 = arith.constant 0 : index
    %c0_118 = arith.constant 0 : index
    %365 = vector.load %arg10[%c0_117, %c0_118] : memref<2x128xf32, #tpu.memory_space<vmem>>, vector<2x128xf32>
    tpu.vector_store %arg10[%c0_117, %c0_118], %364 {strides = array<i32>} : memref<2x128xf32, #tpu.memory_space<vmem>>, vector<2x128xf32>,
    return
  }
}

</mosaic_0001>

<bundles_post_ra>
// kernel: tpu_custom_call.1
= control target key start
LH: loop header
LB: loop body
LE: loop exit
PB: predicated region body
PF: predicated region fallthrough
CT: control target
= control target key end

     0   :  { %16 = vsyncpa [#allocation3], 0  ;;  %s5462_s0 = inlined_call_operand.hbm [shape: f32[16,32], index: 0, kind: input, shape index: {}]   ;;  %s5463_s1 = inlined_call_operand.vmem [shape: f32[2,8], index: 1, kind: input, shape index: {}]   ;;  %s5464_s2 = inlined_call_operand.hbm [shape: f32[3,128], index: 2, kind: input, shape index: {}]   ;;  %s5465_s3 = inlined_call_operand.hbm [shape: f32[32,128], index: 3, kind: input, shape index: {}]   ;;  %s5466_s4 = inlined_call_operand.vmem [shape: f32[2,32,96], index: 4, kind: input, shape index: {}]   ;;  %s5467_s5 = inlined_call_operand.vmem [shape: f32[2,32,32], index: 5, kind: input, shape index: {}]   ;;  %s5468_s6 = inlined_call_operand.vmem [shape: f32[2,32,64], index: 6, kind: input, shape index: {}]   ;;  %s5469_s7 = inlined_call_operand.vmem [shape: f32[2,64,32], index: 7, kind: input, shape index: {}]   ;;  %s5470_s8 = inlined_call_operand.vmem [shape: f32[2,8,128], index: 8, kind: input, shape index: {}]   ;;  %s5471_s9 = inlined_call_operand.hbm [shape: f32[2,32], index: 9, kind: output, shape index: {0}]   ;;  %s5472_s10 = inlined_call_operand.hbm [shape: f32[2,128], index: 10, kind: output, shape index: {1}]  }
   0x1   :  { %17 = vsyncpa [#allocation6], 0 }
   0x2   :  { %18 = vsyncpa [#allocation4], 0 }
   0x3   :  { %19 = vsyncpa [#allocation10], 0  ;;  %s4718_s13 = smov [#allocation5]   ;;  %s4719_s15 = smov [#allocation2]  }
   0x4   :  { %s40_s14 = sshll.u32 %s4718_s13, 4  ;;  %s25_s16 = sshll.u32 %s4719_s15, 4  ;;  %s41_s14 = int_to_ptr.vmem [resolvable:$true] %s40_s14  ;;  %s4797_s16 = int_to_ptr.vmem [resolvable:$true] %s25_s16 }
   0x5   :  { %s4600_s19 = scalar_lea.hbm %s5464_s2, 64 }
   0x6   :  { %p4601_p0 = scmp.ne.s32.totalorder %s5464_s2, %s4600_s19  ;;  %p4604_p1 = scmp.lt.u32.totalorder %s4600_s19, %s5464_s2 }
   0x8   :  { %p4606_p2 = pnand %p4604_p1, %p4601_p0 }
   0xa   :  { %4609 = shalt.err (!%p4606_p2)
}
   0xb   :  { %s4610_s24 = scalar_lea.vmem %s41_s14, 64  ;;  %p4615_p4 = scmp.lt.s32.totalorder %s41_s14, %s41_s14 }
   0xc   :  { %p4611_p3 = scmp.ne.s32.totalorder %s41_s14, %s4610_s24  ;;  %p4616_p5 = scmp.lt.s32.totalorder %s4610_s24, %s4610_s24 }
   0xe   :  { %p4617_p6 = por %p4616_p5, %p4615_p4 }
  0x10   :  { %p4618_p7 = pnand %p4617_p6, %p4611_p3 }
  0x12   :  { %4621 = shalt.err (!%p4618_p7)
}
  0x13   :  { %43 = dma.hbm_to_vmem [thread:$0]  %s5464_s2, 64, %s41_s14, [#allocation6]  }
  0x14   :  { %s4622_s29 = scalar_lea.hbm %s5462_s0, 256 }
  0x15   :  { %p4623_p8 = scmp.ne.s32.totalorder %s5462_s0, %s4622_s29  ;;  %p4626_p9 = scmp.lt.u32.totalorder %s4622_s29, %s5462_s0 }
  0x17   :  { %p4628_p10 = pnand %p4626_p9, %p4623_p8 }
  0x19   :  { %4631 = shalt.err (!%p4628_p10)
}
  0x1a   :  { %s4632_s15 = scalar_lea.vmem %s4797_s16, 256  ;;  %p4637_p12 = scmp.lt.s32.totalorder %s4797_s16, %s4797_s16 }
  0x1b   :  { %p4633_p11 = scmp.ne.s32.totalorder %s4797_s16, %s4632_s15  ;;  %p4638_p13 = scmp.lt.s32.totalorder %s4632_s15, %s4632_s15 }
  0x1d   :  { %p4639_p0 = por %p4638_p13, %p4637_p12 }
  0x1f   :  { %p4640_p1 = pnand %p4639_p0, %p4633_p11 }
  0x21   :  { %4643 = shalt.err (!%p4640_p1)
}
  0x22   :  { %s4720_s2 = smov 128   ;;  %s4721_s14 = smov 8  }
  0x23   :  { %31 = dma.hbm_to_vmem [thread:$0]  %s5462_s0, 256, %s4797_s16, [#allocation3], %s4720_s2, %s4720_s2, %s4721_s14  }
  0x24   :  { %s4722_s19 = smov [#allocation7]   ;;  %s4644_s23 = scalar_lea.hbm %s5465_s3, 512 }
  0x25   :  { %s49_s20 = sshll.u32 %s4722_s19, 4  ;;  %p4645_p2 = scmp.ne.s32.totalorder %s5465_s3, %s4644_s23  ;;  %s50_s20 = int_to_ptr.vmem [resolvable:$true] %s49_s20 }
  0x26   :  { %p4648_p3 = scmp.lt.u32.totalorder %s4644_s23, %s5465_s3 }
  0x28   :  { %p4650_p4 = pnand %p4648_p3, %p4645_p2 }
  0x2a   :  { %4653 = shalt.err (!%p4650_p4)
}
  0x2b   :  { %s4654_s28 = scalar_lea.vmem %s50_s20, 512  ;;  %p4659_p6 = scmp.lt.s32.totalorder %s50_s20, %s50_s20 }
  0x2c   :  { %p4655_p5 = scmp.ne.s32.totalorder %s50_s20, %s4654_s28  ;;  %p4660_p7 = scmp.lt.s32.totalorder %s4654_s28, %s4654_s28 }
  0x2e   :  { %p4661_p8 = por %p4660_p7, %p4659_p6 }
  0x30   :  { %p4662_p9 = pnand %p4661_p8, %p4655_p5 }
  0x32   :  { %4665 = shalt.err (!%p4662_p9)
}
  0x33   :  { %55 = dma.hbm_to_vmem [thread:$0]  %s5465_s3, 512, %s50_s20, [#allocation6], %s4720_s2, %s4720_s2, %s4721_s14  }
  0x34   :  { %4710 = dma.done.wait [#allocation3], 256  }
  0x35   :  { %4711 = vsyncadd [#allocation3], 4294967040 }
  0x36   :  { %4712 = dma.done.wait [#allocation6], 576  }
  0x37   :  { %4713 = vsyncadd [#allocation6], 4294966720  ;;  %vm78_vm0 = vcmask 261120   ;;  %v76_v0 = vld [vmem:[#allocation2] sm:$0xff]  ;;  %v77_v1 = vld [vmem:[#allocation2 + $0x8] sm:$0xff]  ;;  %v106_v22 = vlaneseq  ;;  %v4723_v41 = vmov 0.0  }
  0x38   :  { %v79_v2 = vsel %vm78_vm0, %v76_v0, 0.0  ;;  %v82_v3 = vsel %vm78_vm0, %v77_v1, 0.0  ;;  %v143_v14 = vld [vmem:[%s5466_s4] sm:$0xff]  ;;  %v144_v15 = vld [vmem:[%s5466_s4 + $0x8] sm:$0xff]  ;;  %v145_v16 = vld [vmem:[%s5466_s4 + $0x10] sm:$0xff]  ;;  %4133 = vmatprep.subr.mxu1 %v4723_v41  ;;  %vm4724_vm1 = vmmov 0  }
  0x39   :  { %80 = vadd.xlane.f32.xlu0 %v79_v2  ;;  %v4397_v17 = vpack.c.bf16 %v144_v15, %v143_v14  ;;  %v146_v18 = vld [vmem:[%s5466_s4 + $0x18] sm:$0xff]  ;;  %v4858_v26 = vshrl.u32 %v106_v22, 7  ;;  %v75_v29 = vld [vmem:[#allocation5] sm:$0x7]  ;;  %4135 = vmatprep.mubr.msk.f32.mxu1 %vm4724_vm1, %v4723_v41  ;;  %v4885_v42 = vld [vmem:[%s5470_s8] sm:$0xff]  ;;  %s4725_s19 = smov 96  }
  0x3a   :  { %v4401_v19 = vpack.c.bf16 %v146_v18, %v145_v16  ;;  %vm235_vm2 = vcmask 64512   ;;  %v4726_v50 = vmov 1966171168   ;;  %s4728_s22 = smov 88   ;;  %s4729_s23 = smov 120   ;;  %vm1606_vm3 = vcmask 195584  }
  0x3b   :  { %4398 = vmatprep.subr.bf16.mxu0 %v4397_v17  ;;  %v4861_v28 = vsub.s32 0, %v4858_v26  ;;  %v4864_v30 = vsub.s32 1, %v4858_v26  ;;  %v129_v51 = vunpack.c.l.s4 %v4726_v50  ;;  %v3910_v54 = vld.sshfl [vmem:[%s5463_s1] sm:$0x11 pattern:$0x75316420] }
  0x3c   :  { %4400 = vmatpush3.bf16.msra.mxu0 %v4397_v17  ;;  %v127_v55 = vcombine.high %v3910_v54, %v3910_v54  ;;  %s4727_s1 = smov 64   ;;  %s4730_s24 = smov 56   ;;  %vm1603_vm4 = vcmask 130048   ;;  %vm1849_vm5 = vcmask 523264   ;;  %vm3794_vm6 = vcmask 1041409  }
  0x3d   :  { %83 = vadd.xlane.f32.xlu0 %v82_v3  ;;  %4402 = vmatprep.subr.bf16.mxu0 %v4401_v19  ;;  %v109_v31 = vrot.slane %v75_v29, %v4861_v28  ;;  %v115_v34 = vrot.slane %v75_v29, %v4864_v30  ;;  %v150_v43 = vrot.slane %v4885_v42, %v4861_v28  ;;  %v130_v52 = vunpack.c.0.s8 %v129_v51  ;;  %s4731_s25 = smov 80   ;;  %s4732_s26 = smov 112  }
  0x3e   :  { %s4733_s27 = smov 48   ;;  %s4734_s28 = smov 72   ;;  %vm3797_vm7 = vcmask 254976  }
  0x3f   :  { %v133_v53 = vsub.s32 %v130_v52, %v4858_v26  ;;  %s4735_s0 = smov 104   ;;  %s4736_s16 = smov 40  }
  0x40   :  { %4404 = vmatpush3.bf16.msra.mxu0 %v4401_v19  ;;  %s4737_s3 = smov 16   ;;  %s4738_s18 = smov 24  }
  0x41   :  { %4153 = vmatprep.subr.mxu0 %v4723_v41  ;;  %v134_v56 = vrot.slane %v3910_v54, %v133_v53  ;;  %v141_v57 = vrot.slane %v127_v55, %v133_v53 }
  0x43   :  { %v4914_v58 = vrot.slane %v134_v56, %v4861_v28  ;;  %v4917_v62 = vrot.slane %v141_v57, %v4861_v28 }
  0xc6   :  { %v81_v4 = vpop.xlane.xlu0 %80 }
  0xc7   :  { %v86_v5 = vmul.f32 0.03125, %v81_v4 }
  0xc9   :  { %v88_v6 = vsub.f32 %v76_v0, %v86_v5 }
  0xca   :  { %v84_v7 = vpop.xlane.xlu0 %83 }
  0xcb   :  { %v87_v8 = vmul.f32 0.03125, %v84_v7  ;;  %v90_v9 = vmul.f32 %v88_v6, %v88_v6 }
  0xcd   :  { %v89_v10 = vsub.f32 %v77_v1, %v87_v8  ;;  %v92_v11 = vsel %vm78_vm0, %v90_v9, 0.0 }
  0xce   :  { %93 = vadd.xlane.f32.xlu1 %v92_v11 }
  0xcf   :  { %v91_v12 = vmul.f32 %v89_v10, %v89_v10 }
  0xd1   :  { %v95_v13 = vsel %vm78_vm0, %v91_v12, 0.0 }
  0xd2   :  { %96 = vadd.xlane.f32.xlu1 %v95_v13 }
 0x15b   :  { %v94_v20 = vpop.xlane.xlu1 %93 }
 0x15c   :  { %v98_v21 = vmul.f32 0.03125, %v94_v20 }
 0x15e   :  { %v100_v23 = vadd.f32 1e-12, %v98_v21 }
 0x15f   :  { %v97_v24 = vpop.xlane.xlu1 %96 }
 0x160   :  { %4507 = vrsqrt.f32 %v100_v23  ;;  %v99_v25 = vmul.f32 0.03125, %v97_v24 }
 0x162   :  { %v101_v27 = vadd.f32 1e-12, %v99_v25 }
 0x164   :  { %4509 = vrsqrt.f32 %v101_v27 }
 0x16a   :  { %v4508_v32 = vpop.eup %4507 }
 0x16b   :  { %v104_v33 = vmul.f32 %v4508_v32, %v88_v6 }
 0x16d   :  { %v110_v35 = vmul.f32 %v109_v31, %v104_v33 }
 0x16e   :  { %v4510_v36 = vpop.eup %4509 }
 0x16f   :  { %v105_v37 = vmul.f32 %v4510_v36, %v89_v10  ;;  %v4868_v38 = vadd.f32 %v115_v34, %v110_v35 }
 0x171   :  { %v111_v39 = vmul.f32 %v109_v31, %v105_v37  ;;  %4130 = vmatprep.mubr.msk.f32.mxu0 %vm78_vm0, %v4868_v38 }
 0x173   :  { %v4872_v40 = vadd.f32 %v115_v34, %v111_v39 }
 0x175   :  { %4131 = vmatmul.mubr.msk.f32.vlgmr.msra.gmra.mrb[0].mxu0 %vm78_vm0, %v4872_v40 }
 0x176   :  { %4155 = vmatprep.mubr.msk.f32.mxu0 %vm4724_vm1, %v4723_v41 }
 0x248   :  { %v4132_v44 = vpop.f32.mrb[0].mxu0 }
 0x249   :  { %v4889_v45 = vadd.f32 %v4132_v44, %v150_v43  ;;  %v223_v46 = vpop.f32.mrb[1].mxu0 }
 0x24a   :  { %v4891_v47 = vadd.f32 %v223_v46, %v150_v43 }
 0x24b   :  { %311 = vrot.lane.b32.xlu1 %v4889_v45, %s4725_s19 }
 0x24c   :  { %233 = vrot.lane.b32.xlu0 %v4891_v47, %s4725_s19 }
 0x2bd   :  { %v312_v49 = vpop.permute.xlu1 %311 }
 0x2be   :  { %v234_v48 = vpop.permute.xlu0 %233 }
 0x2bf   :  { %4134 = vmatpush3.xpose.msk.msra.mxu1 %vm235_vm2, %v234_v48 }
 0x2c0   :  { %4138 = vmatprep.subr.mxu1 %v4723_v41 }
 0x2c2   :  { %4136 = vmatmul.mubr.msk.f32.vlgmr.msra.gmra.mrb[0].mxu1 %vm235_vm2, %v4891_v47 }
 0x2c3   :  { %4139 = vmatpush3.xpose.msk.msra.mxu1 %vm235_vm2, %v312_v49  ;;  %4140 = vmatprep.mubr.msk.f32.mxu1 %vm4724_vm1, %v4723_v41 }
 0x2c4   :  { %4143 = vmatprep.subr.mxu1 %v4723_v41 }
 0x2c6   :  { %4141 = vmatmul.mubr.msk.f32.vlgmr.msra.gmra.mrb[2].mxu1 %vm235_vm2, %v4889_v45 }
 0x2c7   :  { %4145 = vmatprep.mubr.msk.f32.mxu1 %vm4724_vm1, %v4723_v41 }
 0x395   :  { %v306_v59 = vpop.f32.mrb[0].mxu1 }
 0x396   :  { %v387_v60 = vmul.f32 0.35355338, %v306_v59  ;;  %v4137_v61 = vpop.f32.mrb[1].mxu1 }
 0x398   :  { %v399_v63 = vadd.f32 %v4914_v58, %v387_v60 }
 0x399   :  { %v383_v0 = vpop.f32.mrb[2].mxu1 }
 0x39a   :  { %v388_v1 = vmul.f32 0.35355338, %v383_v0  ;;  %v4142_v2 = vpop.f32.mrb[3].mxu1  ;;  %v401_v3 = vsel %vm235_vm2, %v399_v63, -inf }
 0x39b   :  { %402 = vmax.xlane.f32.xlu1 %v401_v3 }
 0x39c   :  { %v400_v4 = vadd.f32 %v4917_v62, %v388_v1 }
 0x39e   :  { %v404_v5 = vsel %vm235_vm2, %v400_v4, -inf }
 0x39f   :  { %405 = vmax.xlane.f32.xlu0 %v404_v5 }
 0x3ac   :  { %499 = vrot.lane.b32.xlu1 %v4889_v45, %s4727_s1 }
 0x3b0   :  { %577 = vrot.lane.b32.xlu1 %v4891_v47, %s4728_s22 }
 0x3b4   :  { %655 = vrot.lane.b32.xlu1 %v4889_v45, %s4728_s22 }
 0x428   :  { %v403_v6 = vpop.xlane.xlu1 %402 }
 0x429   :  { %v407_v7 = vsub.f32 %v399_v63, %v403_v6 }
 0x42b   :  { %v409_v8 = vmul.f32 1.442695, %v407_v7 }
 0x42c   :  { %v500_v9 = vpop.permute.xlu1 %499  ;;  %v406_v10 = vpop.xlane.xlu0 %405 }
 0x42d   :  { %4511 = vpow2.f32 %v409_v8  ;;  %v408_v11 = vsub.f32 %v400_v4, %v406_v10 }
 0x42f   :  { %v411_v12 = vmul.f32 1.442695, %v408_v11 }
 0x430   :  { %v578_v13 = vpop.permute.xlu1 %577 }
 0x431   :  { %4513 = vpow2.f32 %v411_v12  ;;  %4154 = vmatpush3.xpose.msk.msra.mxu0 %vm235_vm2, %v578_v13 }
 0x432   :  { %4163 = vmatprep.subr.mxu0 %v4723_v41 }
 0x434   :  { %v656_v18 = vpop.permute.xlu1 %655 }
 0x437   :  { %v4512_v14 = vpop.eup %4511 }
 0x438   :  { %v413_v15 = vsel %vm235_vm2, %v4512_v14, 0.0 }
 0x439   :  { %414 = vadd.xlane.f32.xlu0 %v413_v15 }
 0x43b   :  { %v4514_v16 = vpop.eup %4513 }
 0x43c   :  { %v416_v17 = vsel %vm235_vm2, %v4514_v16, 0.0 }
 0x43d   :  { %417 = vadd.xlane.f32.xlu1 %v416_v17 }
 0x44e   :  { %653 = vrot.lane.b32.xlu1 %v4889_v45, %s4729_s23 }
 0x44f   :  { %423 = vrot.lane.b32.xlu0 %v4891_v47, %s4727_s1 }
 0x453   :  { %575 = vrot.lane.b32.xlu0 %v4891_v47, %s4729_s23 }
 0x4c6   :  { %v415_v19 = vpop.xlane.xlu0 %414 }
 0x4c7   :  { %4515 = vrcp.f32 %v415_v19 }
 0x4ca   :  { %v418_v20 = vpop.xlane.xlu1 %417  ;;  %v424_v21 = vpop.permute.xlu0 %423 }
 0x4cb   :  { %4517 = vrcp.f32 %v418_v20  ;;  %4144 = vmatpush3.msra.mxu1 %v424_v21 }
 0x4cc   :  { %4148 = vmatprep.subr.mxu1 %v4723_v41 }
 0x4ce   :  { %v576_v22 = vpop.permute.xlu0 %575  ;;  %v654_v29 = vpop.permute.xlu1 %653 }
 0x4cf   :  { %4156 = vmatmul.mubr.msk.f32.vlgmr.msra.gmra.mrb[2].mxu0 %vm235_vm2, %v576_v22 }
 0x4d0   :  { %4165 = vmatprep.mubr.msk.f32.mxu0 %vm4724_vm1, %v4723_v41 }
 0x4d1   :  { %v4516_v23 = vpop.eup %4515 }
 0x4d2   :  { %v420_v24 = vmul.f32 %v4516_v23, %v4512_v14 }
 0x4d4   :  { %4146 = vmatmul.mubr.msk.f32.vlgmr.msra.gmra.mrb[4].mxu1 %vm235_vm2, %v420_v24 }
 0x4d5   :  { %v4518_v25 = vpop.eup %4517  ;;  %4149 = vmatpush3.msra.mxu1 %v500_v9  ;;  %4150 = vmatprep.mubr.msk.f32.mxu1 %vm4724_vm1, %v4723_v41 }
 0x4d6   :  { %v422_v27 = vmul.f32 %v4518_v25, %v4514_v16  ;;  %4158 = vmatprep.subr.mxu1 %v4723_v41 }
 0x4d8   :  { %4151 = vmatmul.mubr.msk.f32.vlgmr.msra.gmra.mrb[6].mxu1 %vm235_vm2, %v422_v27 }
 0x4d9   :  { %4160 = vmatprep.mubr.msk.f32.mxu1 %vm4724_vm1, %v4723_v41 }
 0x4dc   :  { %4159 = vmatpush3.xpose.msk.msra.mxu1 %vm235_vm2, %v656_v18 }
 0x4dd   :  { %4168 = vmatprep.subr.mxu1 %v4723_v41 }
 0x4df   :  { %4161 = vmatmul.mubr.msk.f32.vlgmr.msra.gmra.mrb[8].mxu1 %vm235_vm2, %v654_v29 }
 0x4e0   :  { %4170 = vmatprep.mubr.msk.f32.mxu1 %vm4724_vm1, %v4723_v41 }
 0x5a2   :  { %v649_v31 = vpop.f32.mrb[2].mxu0 }
 0x5a3   :  { %v731_v32 = vmul.f32 0.35355338, %v649_v31  ;;  %v4157_v33 = vpop.f32.mrb[3].mxu0 }
 0x5a5   :  { %v733_v34 = vadd.f32 %v731_v32, %v4914_v58 }
 0x5a7   :  { %v4956_v35 = vpop.f32.mrb[4].mxu1  ;;  %v735_v36 = vsel %vm235_vm2, %v733_v34, -inf }
 0x5a8   :  { %736 = vmax.xlane.f32.xlu0 %v735_v36  ;;  %v4147_v37 = vpop.f32.mrb[5].mxu1 }
 0x5ab   :  { %v4959_v39 = vpop.f32.mrb[6].mxu1 }
 0x5ac   :  { %v4152_v43 = vpop.f32.mrb[7].mxu1 }
 0x5b2   :  { %v727_v44 = vpop.f32.mrb[8].mxu1 }
 0x5b3   :  { %v732_v46 = vmul.f32 0.35355338, %v727_v44  ;;  %v4162_v48 = vpop.f32.mrb[9].mxu1 }
 0x5b5   :  { %v734_v49 = vadd.f32 %v732_v46, %v4917_v62 }
 0x5b7   :  { %v738_v50 = vsel %vm235_vm2, %v734_v49, -inf }
 0x5b8   :  { %739 = vmax.xlane.f32.xlu1 %v738_v50 }
 0x5c9   :  { %833 = vrot.lane.b32.xlu1 %v4889_v45, %s4730_s24 }
 0x5cd   :  { %911 = vrot.lane.b32.xlu1 %v4891_v47, %s4731_s25 }
 0x5d1   :  { %989 = vrot.lane.b32.xlu1 %v4889_v45, %s4731_s25 }
 0x5d5   :  { %987 = vrot.lane.b32.xlu1 %v4889_v45, %s4732_s26 }
 0x635   :  { %v737_v51 = vpop.xlane.xlu0 %736 }
 0x636   :  { %v741_v52 = vsub.f32 %v733_v34, %v737_v51 }
 0x638   :  { %v743_v53 = vmul.f32 1.442695, %v741_v52 }
 0x63a   :  { %4519 = vpow2.f32 %v743_v53 }
 0x644   :  { %v4520_v54 = vpop.eup %4519 }
 0x645   :  { %v740_v55 = vpop.xlane.xlu1 %739  ;;  %v747_v56 = vsel %vm235_vm2, %v4520_v54, 0.0 }
 0x646   :  { %748 = vadd.xlane.f32.xlu0 %v747_v56  ;;  %v742_v59 = vsub.f32 %v734_v49, %v740_v55 }
 0x648   :  { %v745_v60 = vmul.f32 1.442695, %v742_v59 }
 0x649   :  { %v834_v57 = vpop.permute.xlu1 %833 }
 0x64a   :  { %4169 = vmatpush3.msra.mxu1 %v834_v57  ;;  %4521 = vpow2.f32 %v745_v60 }
 0x64b   :  { %4178 = vmatprep.subr.mxu1 %v4723_v41 }
 0x64d   :  { %v912_v4 = vpop.permute.xlu1 %911 }
 0x651   :  { %v990_v8 = vpop.permute.xlu1 %989 }
 0x654   :  { %v4522_v61 = vpop.eup %4521 }
 0x655   :  { %v750_v63 = vsel %vm235_vm2, %v4522_v61, 0.0  ;;  %v988_v10 = vpop.permute.xlu1 %987 }
 0x65c   :  { %757 = vrot.lane.b32.xlu0 %v4891_v47, %s4730_s24 }
 0x67b   :  { %751 = vadd.xlane.f32.xlu0 %v750_v63 }
 0x691   :  { %909 = vrot.lane.b32.xlu0 %v4891_v47, %s4732_s26 }
 0x6d3   :  { %v749_v0 = vpop.xlane.xlu0 %748 }
 0x6d4   :  { %4523 = vrcp.f32 %v749_v0 }
 0x6d7   :  { %v758_v1 = vpop.permute.xlu0 %757 }
 0x6d8   :  { %4164 = vmatpush3.msra.mxu0 %v758_v1 }
 0x6d9   :  { %4173 = vmatprep.subr.mxu0 %v4723_v41 }
 0x6de   :  { %v4524_v2 = vpop.eup %4523 }
 0x6df   :  { %v754_v3 = vmul.f32 %v4524_v2, %v4520_v54 }
 0x6e1   :  { %4166 = vmatmul.mubr.msk.f32.vlgmr.msra.gmra.mrb[4].mxu0 %vm235_vm2, %v754_v3 }
 0x6e2   :  { %4174 = vmatpush3.xpose.msk.msra.mxu0 %vm235_vm2, %v912_v4  ;;  %4175 = vmatprep.mubr.msk.f32.mxu0 %vm4724_vm1, %v4723_v41 }
 0x6e3   :  { %4183 = vmatprep.subr.mxu0 %v4723_v41 }
 0x708   :  { %v752_v5 = vpop.xlane.xlu0 %751 }
 0x709   :  { %4525 = vrcp.f32 %v752_v5 }
 0x70c   :  { %v910_v6 = vpop.permute.xlu0 %909 }
 0x70d   :  { %4176 = vmatmul.mubr.msk.f32.vlgmr.msra.gmra.mrb[6].mxu0 %vm235_vm2, %v910_v6 }
 0x70e   :  { %4185 = vmatprep.mubr.msk.f32.mxu0 %vm4724_vm1, %v4723_v41 }
 0x713   :  { %v4526_v7 = vpop.eup %4525 }
 0x714   :  { %v756_v9 = vmul.f32 %v4526_v7, %v4522_v61 }
 0x716   :  { %4171 = vmatmul.mubr.msk.f32.vlgmr.msra.gmra.mrb[10].mxu1 %vm235_vm2, %v756_v9 }
 0x717   :  { %4179 = vmatpush3.xpose.msk.msra.mxu1 %vm235_vm2, %v990_v8  ;;  %4180 = vmatprep.mubr.msk.f32.mxu1 %vm4724_vm1, %v4723_v41 }
 0x718   :  { %4188 = vmatprep.subr.mxu1 %v4723_v41 }
 0x71a   :  { %4181 = vmatmul.mubr.msk.f32.vlgmr.msra.gmra.mrb[12].mxu1 %vm235_vm2, %v988_v10 }
 0x71b   :  { %4190 = vmatprep.mubr.msk.f32.mxu1 %vm4724_vm1, %v4723_v41 }
 0x7b4   :  { %v4995_v11 = vpop.f32.mrb[4].mxu0 }
 0x7b5   :  { %v4167_v12 = vpop.f32.mrb[5].mxu0 }
 0x7e0   :  { %v983_v13 = vpop.f32.mrb[6].mxu0 }
 0x7e1   :  { %v1065_v14 = vmul.f32 0.35355338, %v983_v13  ;;  %v4177_v15 = vpop.f32.mrb[7].mxu0 }
 0x7e3   :  { %v1067_v16 = vadd.f32 %v1065_v14, %v4914_v58 }
 0x7e5   :  { %v1069_v17 = vsel %vm235_vm2, %v1067_v16, -inf }
 0x7e6   :  { %1070 = vmax.xlane.f32.xlu0 %v1069_v17 }
 0x7e9   :  { %v4999_v18 = vpop.f32.mrb[10].mxu1 }
 0x7ea   :  { %v4172_v19 = vpop.f32.mrb[11].mxu1 }
 0x7ed   :  { %v1061_v20 = vpop.f32.mrb[12].mxu1 }
 0x7ee   :  { %v1066_v21 = vmul.f32 0.35355338, %v1061_v20  ;;  %v4182_v22 = vpop.f32.mrb[13].mxu1 }
 0x7f0   :  { %v1068_v23 = vadd.f32 %v1066_v21, %v4917_v62 }
 0x7f2   :  { %v1072_v24 = vsel %vm235_vm2, %v1068_v23, -inf }
 0x7f3   :  { %1073 = vmax.xlane.f32.xlu1 %v1072_v24 }
 0x804   :  { %1167 = vrot.lane.b32.xlu1 %v4889_v45, %s4733_s27 }
 0x808   :  { %1245 = vrot.lane.b32.xlu1 %v4891_v47, %s4734_s28 }
 0x80c   :  { %1323 = vrot.lane.b32.xlu1 %v4889_v45, %s4734_s28 }
 0x810   :  { %1321 = vrot.lane.b32.xlu1 %v4889_v45, %s4735_s0 }
 0x873   :  { %v1071_v25 = vpop.xlane.xlu0 %1070 }
 0x874   :  { %v1075_v27 = vsub.f32 %v1067_v16, %v1071_v25 }
 0x876   :  { %v1077_v29 = vmul.f32 1.442695, %v1075_v27 }
 0x878   :  { %4527 = vpow2.f32 %v1077_v29  ;;  %v1610_v29 = vld [vmem:[%s5467_s5 + $0x8] sm:$0xff] }
 0x880   :  { %v1074_v31 = vpop.xlane.xlu1 %1073 }
 0x881   :  { %v1076_v36 = vsub.f32 %v1068_v23, %v1074_v31 }
 0x882   :  { %v4528_v32 = vpop.eup %4527 }
 0x883   :  { %v1081_v33 = vsel %vm235_vm2, %v4528_v32, 0.0  ;;  %v1079_v37 = vmul.f32 1.442695, %v1076_v36 }
 0x884   :  { %1082 = vadd.xlane.f32.xlu0 %v1081_v33  ;;  %v1168_v34 = vpop.permute.xlu1 %1167  ;;  %v1612_v33 = vld [vmem:[%s5467_s5 + $0x18] sm:$0xff] }
 0x885   :  { %4189 = vmatpush3.msra.mxu1 %v1168_v34  ;;  %4529 = vpow2.f32 %v1079_v37 }
 0x886   :  { %4198 = vmatprep.subr.mxu1 %v4723_v41 }
 0x888   :  { %v1246_v51 = vpop.permute.xlu1 %1245 }
 0x88c   :  { %v1324_v55 = vpop.permute.xlu1 %1323 }
 0x88f   :  { %v4530_v43 = vpop.eup %4529 }
 0x890   :  { %v1084_v44 = vsel %vm235_vm2, %v4530_v43, 0.0  ;;  %v1322_v57 = vpop.permute.xlu1 %1321 }
 0x89a   :  { %1091 = vrot.lane.b32.xlu0 %v4891_v47, %s4733_s27 }
 0x8b9   :  { %1085 = vadd.xlane.f32.xlu0 %v1084_v44 }
 0x8cf   :  { %1243 = vrot.lane.b32.xlu0 %v4891_v47, %s4735_s0 }
 0x911   :  { %v1083_v46 = vpop.xlane.xlu0 %1082 }
 0x912   :  { %4531 = vrcp.f32 %v1083_v46 }
 0x915   :  { %v1092_v48 = vpop.permute.xlu0 %1091 }
 0x916   :  { %4184 = vmatpush3.msra.mxu0 %v1092_v48 }
 0x917   :  { %4193 = vmatprep.subr.mxu0 %v4723_v41 }
 0x91c   :  { %v4532_v49 = vpop.eup %4531 }
 0x91d   :  { %v1088_v50 = vmul.f32 %v4532_v49, %v4528_v32  ;;  %v1611_v32 = vld [vmem:[%s5467_s5 + $0x10] sm:$0xff] }
 0x91e   :  { %v4409_v34 = vpack.c.bf16 %v1612_v33, %v1611_v32 }
 0x91f   :  { %4186 = vmatmul.mubr.msk.f32.vlgmr.msra.gmra.mrb[8].mxu0 %vm235_vm2, %v1088_v50 }
 0x920   :  { %4194 = vmatpush3.xpose.msk.msra.mxu0 %vm235_vm2, %v1246_v51  ;;  %4195 = vmatprep.mubr.msk.f32.mxu0 %vm4724_vm1, %v4723_v41 }
 0x921   :  { %4203 = vmatprep.subr.mxu0 %v4723_v41 }
 0x946   :  { %v1086_v52 = vpop.xlane.xlu0 %1085 }
 0x947   :  { %4533 = vrcp.f32 %v1086_v52 }
 0x94a   :  { %v1244_v53 = vpop.permute.xlu0 %1243 }
 0x94b   :  { %4196 = vmatmul.mubr.msk.f32.vlgmr.msra.gmra.mrb[10].mxu0 %vm235_vm2, %v1244_v53 }
 0x94c   :  { %4205 = vmatprep.mubr.msk.f32.mxu0 %vm4724_vm1, %v4723_v41 }
 0x951   :  { %v4534_v54 = vpop.eup %4533 }
 0x952   :  { %v1090_v56 = vmul.f32 %v4534_v54, %v4530_v43 }
 0x954   :  { %4191 = vmatmul.mubr.msk.f32.vlgmr.msra.gmra.mrb[14].mxu1 %vm235_vm2, %v1090_v56 }
 0x955   :  { %4199 = vmatpush3.xpose.msk.msra.mxu1 %vm235_vm2, %v1324_v55  ;;  %4200 = vmatprep.mubr.msk.f32.mxu1 %vm4724_vm1, %v4723_v41 }
 0x956   :  { %4208 = vmatprep.subr.mxu1 %v4723_v41 }
 0x958   :  { %4201 = vmatmul.mubr.msk.f32.vlgmr.msra.gmra.mrb[16].mxu1 %vm235_vm2, %v1322_v57 }
 0x959   :  { %4210 = vmatprep.mubr.msk.f32.mxu1 %vm4724_vm1, %v4723_v41 }
 0x9f2   :  { %v1163_v59 = vpop.f32.mrb[8].mxu0 }
 0x9f3   :  { %v4187_v60 = vpop.f32.mrb[9].mxu0 }
 0xa1e   :  { %v1317_v61 = vpop.f32.mrb[10].mxu0 }
 0xa1f   :  { %v1399_v63 = vmul.f32 0.35355338, %v1317_v61  ;;  %v4197_v0 = vpop.f32.mrb[11].mxu0 }
 0xa21   :  { %v1401_v1 = vadd.f32 %v1399_v63, %v4914_v58 }
 0xa23   :  { %v1403_v2 = vsel %vm235_vm2, %v1401_v1, -inf }
 0xa24   :  { %1404 = vmax.xlane.f32.xlu0 %v1403_v2 }
 0xa27   :  { %v1239_v3 = vpop.f32.mrb[14].mxu1 }
 0xa28   :  { %v4192_v4 = vpop.f32.mrb[15].mxu1 }
 0xa2b   :  { %v1395_v5 = vpop.f32.mrb[16].mxu1 }
 0xa2c   :  { %v1400_v6 = vmul.f32 0.35355338, %v1395_v5  ;;  %v4202_v7 = vpop.f32.mrb[17].mxu1 }
 0xa2e   :  { %v1402_v8 = vadd.f32 %v1400_v6, %v4917_v62 }
 0xa30   :  { %v1406_v9 = vsel %vm235_vm2, %v1402_v8, -inf }
 0xa31   :  { %1407 = vmax.xlane.f32.xlu1 %v1406_v9 }
 0xa42   :  { %1501 = vrot.lane.b32.xlu1 %v4889_v45, %s4736_s16 }
 0xa46   :  { %1579 = vrot.lane.b32.xlu1 %v4995_v11, %s4721_s14 }
 0xa4a   :  { %1581 = vrot.lane.b32.xlu1 %v4999_v18, %s4721_s14 }
 0xa4e   :  { %1589 = vrot.lane.b32.xlu1 %v1239_v3, %s4737_s3 }
 0xab1   :  { %v1405_v10 = vpop.xlane.xlu0 %1404 }
 0xab2   :  { %v1409_v12 = vsub.f32 %v1401_v1, %v1405_v10 }
 0xab4   :  { %v1411_v13 = vmul.f32 1.442695, %v1409_v12 }
 0xab6   :  { %4535 = vpow2.f32 %v1411_v13 }
 0xabe   :  { %v1408_v14 = vpop.xlane.xlu1 %1407 }
 0xabf   :  { %v1410_v15 = vsub.f32 %v1402_v8, %v1408_v14  ;;  %v1739_v14 = vld [vmem:[%s5468_s6 + $0x8] sm:$0xff] }
 0xac0   :  { %v4536_v16 = vpop.eup %4535 }
 0xac1   :  { %v1413_v17 = vmul.f32 1.442695, %v1410_v15  ;;  %v1415_v19 = vsel %vm235_vm2, %v4536_v16, 0.0 }
 0xac2   :  { %1416 = vadd.xlane.f32.xlu0 %v1415_v19  ;;  %v1502_v45 = vpop.permute.xlu1 %1501 }
 0xac3   :  { %4537 = vpow2.f32 %v1413_v17  ;;  %4209 = vmatpush3.msra.mxu1 %v1502_v45  ;;  %v1741_v17 = vld [vmem:[%s5468_s6 + $0x18] sm:$0xff] }
 0xac6   :  { %v1580_v46 = vpop.permute.xlu1 %1579 }
 0xac7   :  { %v1601_v50 = vsel %vm235_vm2, %v4956_v35, %v1580_v46  ;;  %v1616_v35 = vrot.slane %v4885_v42, %v4864_v30 }
 0xaca   :  { %v1582_v49 = vpop.permute.xlu1 %1581 }
 0xacb   :  { %v1602_v55 = vsel %vm235_vm2, %v4959_v39, %v1582_v49  ;;  %v1840_v49 = vld [vmem:[%s5469_s7 + $0x18] sm:$0xff] }
 0xacd   :  { %v4538_v11 = vpop.eup %4537 }
 0xace   :  { %v1418_v18 = vsel %vm235_vm2, %v4538_v11, 0.0  ;;  %v1590_v54 = vpop.permute.xlu1 %1589 }
 0xacf   :  { %1419 = vadd.xlane.f32.xlu0 %v1418_v18  ;;  %v1605_v56 = vsel %vm1603_vm4, %v1602_v55, %v1590_v54  ;;  %v1843_v54 = vld [vmem:[%s5469_s7 + $0x30] sm:$0xff]  ;;  %v1844_v55 = vld [vmem:[%s5469_s7 + $0x38] sm:$0xff] }
 0xae5   :  { %1425 = vrot.lane.b32.xlu0 %v4891_v47, %s4736_s16  ;;  %v1609_v47 = vld [vmem:[%s5467_s5] sm:$0xff] }
 0xae6   :  { %v4405_v31 = vpack.c.bf16 %v1610_v29, %v1609_v47 }
 0xae9   :  { %1587 = vrot.lane.b32.xlu0 %v1163_v59, %s4737_s3 }
 0xb4f   :  { %v1417_v20 = vpop.xlane.xlu0 %1416 }
 0xb50   :  { %4539 = vrcp.f32 %v1417_v20 }
 0xb5a   :  { %v4540_v22 = vpop.eup %4539 }
 0xb5b   :  { %v1422_v23 = vmul.f32 %v4540_v22, %v4536_v16  ;;  %v1740_v16 = vld [vmem:[%s5468_s6 + $0x10] sm:$0xff] }
 0xb5c   :  { %v1420_v21 = vpop.xlane.xlu0 %1419  ;;  %v4417_v19 = vpack.c.bf16 %v1741_v17, %v1740_v16 }
 0xb5d   :  { %4541 = vrcp.f32 %v1420_v21 }
 0xb60   :  { %v1426_v24 = vpop.permute.xlu0 %1425 }
 0xb61   :  { %4204 = vmatpush3.msra.mxu0 %v1426_v24  ;;  %v1734_v24 = vsub.s32 3, %v4858_v26 }
 0xb62   :  { %4206 = vmatmul.mubr.msk.f32.vlgmr.msra.gmra.mrb[12].mxu0 %vm235_vm2, %v1422_v23  ;;  %4406 = vmatprep.subr.bf16.mxu0 %v4405_v31  ;;  %v5098_v23 = vsub.s32 2, %v4858_v26 }
 0xb63   :  { %4408 = vmatpush3.bf16.msra.mxu0 %v4405_v31  ;;  %v1735_v29 = vrot.slane %v4885_v42, %v1734_v24 }
 0xb64   :  { %4410 = vmatprep.subr.bf16.mxu0 %v4409_v34  ;;  %v1588_v48 = vpop.permute.xlu0 %1587 }
 0xb65   :  { %v1604_v51 = vsel %vm1603_vm4, %v1601_v50, %v1588_v48  ;;  %v1839_v48 = vld [vmem:[%s5469_s7 + $0x10] sm:$0xff] }
 0xb66   :  { %v4425_v50 = vpack.c.bf16 %v1840_v49, %v1839_v48 }
 0xb67   :  { %v4542_v25 = vpop.eup %4541  ;;  %4412 = vmatpush3.bf16.msra.mxu0 %v4409_v34 }
 0xb68   :  { %v1424_v27 = vmul.f32 %v4542_v25, %v4538_v11  ;;  %v1729_v25 = vrot.slane %v4885_v42, %v5098_v23 }
 0xb6a   :  { %4211 = vmatmul.mubr.msk.f32.vlgmr.msra.gmra.mrb[18].mxu1 %vm235_vm2, %v1424_v27 }
 0xc35   :  { %v1497_v36 = vpop.f32.mrb[12].mxu0 }
 0xc36   :  { %1595 = vrot.lane.b32.xlu0 %v1497_v36, %s4738_s18  ;;  %v4207_v37 = vpop.f32.mrb[13].mxu0 }
 0xc3d   :  { %v1573_v43 = vpop.f32.mrb[18].mxu1 }
 0xc3e   :  { %1597 = vrot.lane.b32.xlu1 %v1573_v43, %s4738_s18  ;;  %v4212_v44 = vpop.f32.mrb[19].mxu1  ;;  %v1837_v43 = vld [vmem:[%s5469_s7] sm:$0xff] }
 0xc3f   :  { %v1838_v44 = vld [vmem:[%s5469_s7 + $0x8] sm:$0xff] }
 0xc40   :  { %v4421_v46 = vpack.c.bf16 %v1838_v44, %v1837_v43 }
 0xc42   :  { %4422 = vmatprep.subr.bf16.mxu0 %v4421_v46 }
 0xca8   :  { %v1596_v52 = vpop.permute.xlu0 %1595 }
 0xca9   :  { %v1607_v53 = vsel %vm1606_vm3, %v1604_v51, %v1596_v52  ;;  %v1841_v51 = vld [vmem:[%s5469_s7 + $0x20] sm:$0xff]  ;;  %v1842_v52 = vld [vmem:[%s5469_s7 + $0x28] sm:$0xff] }
 0xcaa   :  { %4221 = vmatprep.mubr.msk.f32.mxu0 %vm78_vm0, %v1607_v53  ;;  %v4429_v53 = vpack.c.bf16 %v1842_v52, %v1841_v51  ;;  %v1967_v51 = vsub.s32 7, %v4858_v26 }
 0xcb0   :  { %v1598_v57 = vpop.permute.xlu1 %1597 }
 0xcb1   :  { %v1608_v59 = vsel %vm1606_vm3, %v1605_v56, %v1598_v57  ;;  %v4433_v56 = vpack.c.bf16 %v1844_v55, %v1843_v54  ;;  %v1744_v57 = vsub.s32 4, %v4858_v26 }
 0xcb2   :  { %4222 = vmatmul.mubr.msk.f32.vlgmr.msra.gmra.mrb[14].mxu0 %vm78_vm0, %v1608_v59 }
 0xcb3   :  { %4424 = vmatpush3.bf16.msra.mxu0 %v4421_v46  ;;  %v1745_v59 = vrot.slane %v4885_v42, %v1744_v57 }
 0xcb4   :  { %4426 = vmatprep.subr.bf16.mxu0 %v4425_v50 }
 0xcb7   :  { %4428 = vmatpush3.bf16.msra.mxu0 %v4425_v50  ;;  %v1961_v50 = vsub.s32 6, %v4858_v26 }
 0xcb8   :  { %4430 = vmatprep.subr.bf16.mxu0 %v4429_v53 }
 0xcb9   :  { %v1962_v52 = vrot.slane %v4885_v42, %v1961_v50 }
 0xcbb   :  { %4432 = vmatpush3.bf16.msra.mxu0 %v4429_v53 }
 0xcbc   :  { %4434 = vmatprep.subr.bf16.mxu0 %v4433_v56 }
 0xcbf   :  { %4436 = vmatpush3.bf16.msra.mxu0 %v4433_v56 }
 0xcc0   :  { %4275 = vmatprep.subr.mxu0 %v4723_v41 }
 0xd85   :  { %v4223_v60 = vpop.f32.mrb[14].mxu0 }
 0xd86   :  { %v1695_v61 = vadd.f32 %v4223_v60, %v1616_v35  ;;  %v1689_v63 = vpop.f32.mrb[15].mxu0 }
 0xd87   :  { %v1690_v0 = vadd.f32 %v1689_v63, %v1616_v35 }
 0xd88   :  { %v1699_v1 = vadd.f32 %v1695_v61, %v4872_v40 }
 0xd89   :  { %v1698_v2 = vadd.f32 %v1690_v0, %v4868_v38  ;;  %v1738_v38 = vld [vmem:[%s5468_s6] sm:$0xff] }
 0xd8a   :  { %v1703_v39 = vsel %vm78_vm0, %v1699_v1, 0.0  ;;  %v4413_v15 = vpack.c.bf16 %v1739_v14, %v1738_v38 }
 0xd8b   :  { %1704 = vadd.xlane.f32.xlu1 %v1703_v39  ;;  %v1700_v3 = vsel %vm78_vm0, %v1698_v2, 0.0 }
 0xd8c   :  { %1701 = vadd.xlane.f32.xlu0 %v1700_v3  ;;  %4414 = vmatprep.subr.bf16.mxu1 %v4413_v15 }
 0xd8d   :  { %4416 = vmatpush3.bf16.msra.mxu1 %v4413_v15 }
 0xd8e   :  { %4418 = vmatprep.subr.bf16.mxu1 %v4417_v19 }
 0xd91   :  { %4420 = vmatpush3.bf16.msra.mxu1 %v4417_v19 }
 0xe18   :  { %v1705_v4 = vpop.xlane.xlu1 %1704 }
 0xe19   :  { %v1707_v5 = vmul.f32 0.03125, %v1705_v4  ;;  %v1702_v6 = vpop.xlane.xlu0 %1701 }
 0xe1a   :  { %v1706_v7 = vmul.f32 0.03125, %v1702_v6 }
 0xe1b   :  { %v1709_v8 = vsub.f32 %v1699_v1, %v1707_v5 }
 0xe1c   :  { %v1708_v9 = vsub.f32 %v1698_v2, %v1706_v7 }
 0xe1d   :  { %v1711_v13 = vmul.f32 %v1709_v8, %v1709_v8 }
 0xe1e   :  { %v1710_v10 = vmul.f32 %v1708_v9, %v1708_v9 }
 0xe1f   :  { %v1715_v40 = vsel %vm78_vm0, %v1711_v13, 0.0 }
 0xe20   :  { %v1712_v12 = vsel %vm78_vm0, %v1710_v10, 0.0 }
 0xe21   :  { %1713 = vadd.xlane.f32.xlu0 %v1712_v12 }
 0xe25   :  { %1716 = vadd.xlane.f32.xlu0 %v1715_v40 }
 0xeae   :  { %v1714_v45 = vpop.xlane.xlu0 %1713 }
 0xeaf   :  { %v1718_v11 = vmul.f32 0.03125, %v1714_v45 }
 0xeb1   :  { %v1720_v18 = vadd.f32 1e-12, %v1718_v11 }
 0xeb2   :  { %v1717_v20 = vpop.xlane.xlu0 %1716 }
 0xeb3   :  { %4543 = vrsqrt.f32 %v1720_v18  ;;  %v1719_v21 = vmul.f32 0.03125, %v1717_v20 }
 0xeb5   :  { %v1721_v22 = vadd.f32 1e-12, %v1719_v21 }
 0xeb7   :  { %4545 = vrsqrt.f32 %v1721_v22 }
 0xebd   :  { %v4544_v27 = vpop.eup %4543 }
 0xebe   :  { %v1724_v47 = vmul.f32 %v4544_v27, %v1708_v9  ;;  %v1847_v9 = vsub.s32 5, %v4858_v26 }
 0xec0   :  { %v1730_v31 = vmul.f32 %v1729_v25, %v1724_v47  ;;  %v1848_v10 = vrot.slane %v4885_v42, %v1847_v9 }
 0xec1   :  { %v4546_v32 = vpop.eup %4545 }
 0xec2   :  { %v1725_v33 = vmul.f32 %v4546_v32, %v1709_v8  ;;  %v1736_v34 = vadd.f32 %v1735_v29, %v1730_v31  ;;  %v3945_v31 = vld [vmem:[%s5466_s4 + $0x28] sm:$0xff] }
 0xec4   :  { %v1731_v36 = vmul.f32 %v1729_v25, %v1725_v33  ;;  %4232 = vmatprep.mubr.msk.f32.mxu1 %vm78_vm0, %v1736_v34  ;;  %v3946_v33 = vld [vmem:[%s5466_s4 + $0x30] sm:$0xff] }
 0xec6   :  { %v1737_v37 = vadd.f32 %v1735_v29, %v1731_v36  ;;  %v3944_v29 = vld [vmem:[%s5466_s4 + $0x20] sm:$0xff] }
 0xec7   :  { %v4437_v32 = vpack.c.bf16 %v3945_v31, %v3944_v29 }
 0xec8   :  { %4233 = vmatmul.mubr.msk.f32.vlgmr.msra.gmra.mrb[20].mxu1 %vm78_vm0, %v1737_v37 }
 0xec9   :  { %4438 = vmatprep.subr.bf16.mxu1 %v4437_v32 }
 0xeca   :  { %4440 = vmatpush3.bf16.msra.mxu1 %v4437_v32 }
 0xf9b   :  { %v4234_v35 = vpop.f32.mrb[20].mxu1 }
 0xf9c   :  { %v1824_v60 = vadd.f32 %v4234_v35, %v1745_v59  ;;  %v1818_v61 = vpop.f32.mrb[21].mxu1 }
 0xf9d   :  { %v1819_v63 = vadd.f32 %v1818_v61, %v1745_v59  ;;  %v1968_v59 = vrot.slane %v4885_v42, %v1967_v51 }
 0xf9e   :  { %v1830_v0 = vmul.f32 0.70710677, %v1824_v60  ;;  %v1828_v6 = vmul.f32 0.5, %v1824_v60 }
 0xf9f   :  { %v1829_v1 = vmul.f32 0.70710677, %v1819_v63  ;;  %v1827_v4 = vmul.f32 0.5, %v1819_v63 }
 0xfa0   :  { %4547 = verf.f32 %v1830_v0  ;;  %v5183_v0 = vld [vmem:[%s5470_s8 + $0x8] sm:$0xff] }
 0xfa1   :  { %4549 = verf.f32 %v1829_v1  ;;  %v1981_v42 = vrot.slane %v5183_v0, %v4861_v28 }
 0xfaa   :  { %v4548_v2 = vpop.eup %4547 }
 0xfab   :  { %v4550_v39 = vpop.eup %4549  ;;  %v1834_v3 = vadd.f32 1.0, %v4548_v2 }
 0xfac   :  { %v1833_v5 = vadd.f32 1.0, %v4550_v39 }
 0xfad   :  { %v1836_v8 = vmul.f32 %v1834_v3, %v1828_v6 }
 0xfae   :  { %v1835_v7 = vmul.f32 %v1833_v5, %v1827_v4 }
 0xfb0   :  { %4251 = vmatprep.mubr.msk.f32.mxu0 %vm1849_vm5, %v1835_v7 }
 0xfb1   :  { %4252 = vmatmul.mubr.msk.f32.vlgmr.msra.gmra.mrb[16].mxu0 %vm1849_vm5, %v1836_v8 }
 0xfb2   :  { %4277 = vmatprep.mubr.msk.f32.mxu0 %vm4724_vm1, %v4723_v41 }
0x1084   :  { %v4253_v12 = vpop.f32.mrb[16].mxu0 }
0x1085   :  { %v1928_v13 = vadd.f32 %v4253_v12, %v1848_v10  ;;  %v1922_v40 = vpop.f32.mrb[17].mxu0 }
0x1086   :  { %v1923_v38 = vadd.f32 %v1922_v40, %v1848_v10 }
0x1087   :  { %v1932_v14 = vadd.f32 %v1928_v13, %v1737_v37 }
0x1088   :  { %v1931_v15 = vadd.f32 %v1923_v38, %v1736_v34  ;;  %v3947_v34 = vld [vmem:[%s5466_s4 + $0x38] sm:$0xff] }
0x1089   :  { %v1936_v16 = vsel %vm78_vm0, %v1932_v14, 0.0  ;;  %v4441_v36 = vpack.c.bf16 %v3947_v34, %v3946_v33 }
0x108a   :  { %1937 = vadd.xlane.f32.xlu1 %v1936_v16  ;;  %v1933_v17 = vsel %vm78_vm0, %v1931_v15, 0.0 }
0x108b   :  { %1934 = vadd.xlane.f32.xlu0 %v1933_v17  ;;  %4442 = vmatprep.subr.bf16.mxu1 %v4441_v36 }
0x108c   :  { %4444 = vmatpush3.bf16.msra.mxu1 %v4441_v36 }
0x108d   :  { %4265 = vmatprep.subr.mxu1 %v4723_v41 }
0x1117   :  { %v1938_v19 = vpop.xlane.xlu1 %1937 }
0x1118   :  { %v1940_v45 = vmul.f32 0.03125, %v1938_v19  ;;  %v1935_v11 = vpop.xlane.xlu0 %1934 }
0x1119   :  { %v1939_v18 = vmul.f32 0.03125, %v1935_v11 }
0x111a   :  { %v1942_v20 = vsub.f32 %v1932_v14, %v1940_v45 }
0x111b   :  { %v1941_v21 = vsub.f32 %v1931_v15, %v1939_v18 }
0x111c   :  { %v1944_v22 = vmul.f32 %v1942_v20, %v1942_v20 }
0x111d   :  { %v1943_v25 = vmul.f32 %v1941_v21, %v1941_v21 }
0x111e   :  { %v1948_v27 = vsel %vm78_vm0, %v1944_v22, 0.0 }
0x111f   :  { %1949 = vadd.xlane.f32.xlu1 %v1948_v27  ;;  %v1945_v47 = vsel %vm78_vm0, %v1943_v25, 0.0 }
0x1120   :  { %1946 = vadd.xlane.f32.xlu0 %v1945_v47 }
0x11ac   :  { %v1950_v37 = vpop.xlane.xlu1 %1949 }
0x11ad   :  { %v1952_v43 = vmul.f32 0.03125, %v1950_v37  ;;  %v1947_v44 = vpop.xlane.xlu0 %1946 }
0x11ae   :  { %v1951_v46 = vmul.f32 0.03125, %v1947_v44 }
0x11af   :  { %v1954_v48 = vadd.f32 1e-12, %v1952_v43 }
0x11b0   :  { %v1953_v49 = vadd.f32 1e-12, %v1951_v46 }
0x11b1   :  { %4551 = vrsqrt.f32 %v1954_v48 }
0x11b2   :  { %4553 = vrsqrt.f32 %v1953_v49 }
0x11bb   :  { %v4552_v53 = vpop.eup %4551 }
0x11bc   :  { %v4554_v54 = vpop.eup %4553  ;;  %v1958_v55 = vmul.f32 %v4552_v53, %v1942_v20 }
0x11bd   :  { %v1957_v56 = vmul.f32 %v4554_v54, %v1941_v21 }
0x11be   :  { %v1964_v35 = vmul.f32 %v1962_v52, %v1958_v55 }
0x11bf   :  { %v1963_v60 = vmul.f32 %v1962_v52, %v1957_v56 }
0x11c0   :  { %v5172_v63 = vadd.f32 %v1968_v59, %v1964_v35 }
0x11c1   :  { %v5170_v61 = vadd.f32 %v1968_v59, %v1963_v60 }
0x11c3   :  { %4262 = vmatprep.mubr.msk.f32.mxu1 %vm78_vm0, %v5170_v61 }
0x11c4   :  { %4263 = vmatmul.mubr.msk.f32.vlgmr.msra.gmra.mrb[22].mxu1 %vm78_vm0, %v5172_v63 }
0x11c5   :  { %4267 = vmatprep.mubr.msk.f32.mxu1 %vm4724_vm1, %v4723_v41 }
0x1297   :  { %v4264_v1 = vpop.f32.mrb[22].mxu1 }
0x1298   :  { %v5187_v2 = vadd.f32 %v4264_v1, %v1981_v42  ;;  %v2054_v39 = vpop.f32.mrb[23].mxu1 }
0x1299   :  { %v5189_v3 = vadd.f32 %v2054_v39, %v1981_v42 }
0x129a   :  { %2141 = vrot.lane.b32.xlu1 %v5187_v2, %s4725_s19 }
0x129b   :  { %2064 = vrot.lane.b32.xlu0 %v5189_v3, %s4725_s19 }
0x130c   :  { %v2142_v5 = vpop.permute.xlu1 %2141 }
0x130d   :  { %v2065_v4 = vpop.permute.xlu0 %2064 }
0x130e   :  { %4266 = vmatpush3.xpose.msk.msra.mxu1 %vm235_vm2, %v2065_v4 }
0x130f   :  { %4270 = vmatprep.subr.mxu1 %v4723_v41 }
0x1311   :  { %4268 = vmatmul.mubr.msk.f32.vlgmr.msra.gmra.mrb[24].mxu1 %vm235_vm2, %v5189_v3 }
0x1312   :  { %4271 = vmatpush3.xpose.msk.msra.mxu1 %vm235_vm2, %v2142_v5  ;;  %4272 = vmatprep.mubr.msk.f32.mxu1 %vm4724_vm1, %v4723_v41 }
0x1313   :  { %4280 = vmatprep.subr.mxu1 %v4723_v41 }
0x1315   :  { %4273 = vmatmul.mubr.msk.f32.vlgmr.msra.gmra.mrb[26].mxu1 %vm235_vm2, %v5187_v2 }
0x1316   :  { %4282 = vmatprep.mubr.msk.f32.mxu1 %vm4724_vm1, %v4723_v41 }
0x13e4   :  { %v2136_v28 = vpop.f32.mrb[24].mxu1 }
0x13e5   :  { %v2217_v6 = vmul.f32 0.35355338, %v2136_v28  ;;  %v4269_v7 = vpop.f32.mrb[25].mxu1 }
0x13e7   :  { %v2219_v8 = vadd.f32 %v2217_v6, %v4914_v58 }
0x13e8   :  { %v2213_v10 = vpop.f32.mrb[26].mxu1 }
0x13e9   :  { %v2218_v12 = vmul.f32 0.35355338, %v2213_v10  ;;  %v4274_v13 = vpop.f32.mrb[27].mxu1  ;;  %v2221_v40 = vsel %vm235_vm2, %v2219_v8, -inf }
0x13ea   :  { %2222 = vmax.xlane.f32.xlu1 %v2221_v40 }
0x13eb   :  { %v2220_v38 = vadd.f32 %v2218_v12, %v4917_v62 }
0x13ed   :  { %v2224_v14 = vsel %vm235_vm2, %v2220_v38, -inf }
0x13ee   :  { %2225 = vmax.xlane.f32.xlu0 %v2224_v14 }
0x13fb   :  { %2319 = vrot.lane.b32.xlu1 %v5187_v2, %s4727_s1 }
0x13ff   :  { %2397 = vrot.lane.b32.xlu1 %v5189_v3, %s4728_s22 }
0x1403   :  { %2475 = vrot.lane.b32.xlu1 %v5187_v2, %s4728_s22 }
0x1404   :  { %2243 = vrot.lane.b32.xlu0 %v5189_v3, %s4727_s1 }
0x1477   :  { %v2223_v15 = vpop.xlane.xlu1 %2222 }
0x1478   :  { %v2227_v16 = vsub.f32 %v2219_v8, %v2223_v15 }
0x147a   :  { %v2229_v17 = vmul.f32 1.442695, %v2227_v16 }
0x147b   :  { %v2320_v19 = vpop.permute.xlu1 %2319  ;;  %v2226_v45 = vpop.xlane.xlu0 %2225 }
0x147c   :  { %4555 = vpow2.f32 %v2229_v17  ;;  %v2228_v11 = vsub.f32 %v2220_v38, %v2226_v45  ;;  %4281 = vmatpush3.msra.mxu1 %v2320_v19 }
0x147d   :  { %4290 = vmatprep.subr.mxu1 %v4723_v41 }
0x147e   :  { %v2231_v18 = vmul.f32 1.442695, %v2228_v11 }
0x147f   :  { %v2244_v20 = vpop.permute.xlu0 %2243  ;;  %v2398_v47 = vpop.permute.xlu1 %2397 }
0x1480   :  { %4557 = vpow2.f32 %v2231_v18  ;;  %4276 = vmatpush3.msra.mxu0 %v2244_v20 }
0x1481   :  { %4285 = vmatprep.subr.mxu0 %v4723_v41 }
0x1483   :  { %v2476_v29 = vpop.permute.xlu1 %2475 }
0x1486   :  { %v4556_v21 = vpop.eup %4555 }
0x1487   :  { %v2233_v22 = vsel %vm235_vm2, %v4556_v21, 0.0 }
0x1488   :  { %2234 = vadd.xlane.f32.xlu0 %v2233_v22 }
0x148a   :  { %v4558_v25 = vpop.eup %4557 }
0x148b   :  { %v2236_v27 = vsel %vm235_vm2, %v4558_v25, 0.0 }
0x148c   :  { %2237 = vadd.xlane.f32.xlu1 %v2236_v27 }
0x149d   :  { %2473 = vrot.lane.b32.xlu1 %v5187_v2, %s4729_s23 }
0x149e   :  { %2395 = vrot.lane.b32.xlu0 %v5189_v3, %s4729_s23 }
0x1515   :  { %v2235_v31 = vpop.xlane.xlu0 %2234 }
0x1516   :  { %4559 = vrcp.f32 %v2235_v31 }
0x1519   :  { %v2238_v32 = vpop.xlane.xlu1 %2237  ;;  %v2396_v43 = vpop.permute.xlu0 %2395 }
0x151a   :  { %4561 = vrcp.f32 %v2238_v32 }
0x151d   :  { %v2474_v44 = vpop.permute.xlu1 %2473 }
0x1520   :  { %v4560_v33 = vpop.eup %4559 }
0x1521   :  { %v2240_v34 = vmul.f32 %v4560_v33, %v4556_v21 }
0x1523   :  { %4278 = vmatmul.mubr.msk.f32.vlgmr.msra.gmra.mrb[18].mxu0 %vm235_vm2, %v2240_v34 }
0x1524   :  { %v4562_v36 = vpop.eup %4561  ;;  %4286 = vmatpush3.xpose.msk.msra.mxu0 %vm235_vm2, %v2398_v47  ;;  %4287 = vmatprep.mubr.msk.f32.mxu0 %vm4724_vm1, %v4723_v41 }
0x1525   :  { %v2242_v37 = vmul.f32 %v4562_v36, %v4558_v25  ;;  %4295 = vmatprep.subr.mxu0 %v4723_v41 }
0x1527   :  { %4283 = vmatmul.mubr.msk.f32.vlgmr.msra.gmra.mrb[28].mxu1 %vm235_vm2, %v2242_v37  ;;  %4288 = vmatmul.mubr.msk.f32.vlgmr.msra.gmra.mrb[20].mxu0 %vm235_vm2, %v2396_v43 }
0x1528   :  { %4291 = vmatpush3.xpose.msk.msra.mxu1 %vm235_vm2, %v2476_v29  ;;  %4292 = vmatprep.mubr.msk.f32.mxu1 %vm4724_vm1, %v4723_v41 }
0x1529   :  { %4300 = vmatprep.subr.mxu1 %v4723_v41  ;;  %4297 = vmatprep.mubr.msk.f32.mxu0 %vm4724_vm1, %v4723_v41 }
0x152b   :  { %4293 = vmatmul.mubr.msk.f32.vlgmr.msra.gmra.mrb[30].mxu1 %vm235_vm2, %v2474_v44 }
0x152c   :  { %4302 = vmatprep.mubr.msk.f32.mxu1 %vm4724_vm1, %v4723_v41 }
0x15f6   :  { %v5243_v46 = vpop.f32.mrb[18].mxu0 }
0x15f7   :  { %v4279_v48 = vpop.f32.mrb[19].mxu0 }
0x15fa   :  { %v5245_v49 = vpop.f32.mrb[28].mxu1  ;;  %v2469_v52 = vpop.f32.mrb[20].mxu0 }
0x15fb   :  { %v2551_v53 = vmul.f32 0.35355338, %v2469_v52  ;;  %v4284_v54 = vpop.f32.mrb[29].mxu1  ;;  %v4289_v55 = vpop.f32.mrb[21].mxu0 }
0x15fd   :  { %v2553_v56 = vadd.f32 %v2551_v53, %v4914_v58 }
0x15fe   :  { %v2547_v59 = vpop.f32.mrb[30].mxu1 }
0x15ff   :  { %v2552_v35 = vmul.f32 0.35355338, %v2547_v59  ;;  %v4294_v60 = vpop.f32.mrb[31].mxu1  ;;  %v2555_v42 = vsel %vm235_vm2, %v2553_v56, -inf }
0x1600   :  { %2556 = vmax.xlane.f32.xlu0 %v2555_v42 }
0x1601   :  { %v2554_v1 = vadd.f32 %v2552_v35, %v4917_v62 }
0x1603   :  { %v2558_v39 = vsel %vm235_vm2, %v2554_v1, -inf }
0x1604   :  { %2559 = vmax.xlane.f32.xlu1 %v2558_v39 }
0x1615   :  { %2653 = vrot.lane.b32.xlu1 %v5187_v2, %s4730_s24 }
0x1616   :  { %2577 = vrot.lane.b32.xlu0 %v5189_v3, %s4730_s24 }
0x1619   :  { %2731 = vrot.lane.b32.xlu1 %v5189_v3, %s4731_s25 }
0x161d   :  { %2809 = vrot.lane.b32.xlu1 %v5187_v2, %s4731_s25 }
0x1621   :  { %2807 = vrot.lane.b32.xlu1 %v5187_v2, %s4732_s26 }
0x168d   :  { %v2557_v4 = vpop.xlane.xlu0 %2556 }
0x168e   :  { %v2561_v5 = vsub.f32 %v2553_v56, %v2557_v4 }
0x1690   :  { %v2563_v28 = vmul.f32 1.442695, %v2561_v5 }
0x1691   :  { %v2578_v6 = vpop.permute.xlu0 %2577  ;;  %v2560_v7 = vpop.xlane.xlu1 %2559 }
0x1692   :  { %4563 = vpow2.f32 %v2563_v28  ;;  %v2562_v8 = vsub.f32 %v2554_v1, %v2560_v7  ;;  %4296 = vmatpush3.msra.mxu0 %v2578_v6 }
0x1693   :  { %4305 = vmatprep.subr.mxu0 %v4723_v41 }
0x1694   :  { %v2565_v10 = vmul.f32 1.442695, %v2562_v8 }
0x1695   :  { %v2654_v12 = vpop.permute.xlu1 %2653 }
0x1696   :  { %4565 = vpow2.f32 %v2565_v10  ;;  %4301 = vmatpush3.msra.mxu1 %v2654_v12 }
0x1697   :  { %4310 = vmatprep.subr.mxu1 %v4723_v41 }
0x1699   :  { %v2732_v17 = vpop.permute.xlu1 %2731 }
0x169c   :  { %v4564_v13 = vpop.eup %4563 }
0x169d   :  { %v2567_v40 = vsel %vm235_vm2, %v4564_v13, 0.0  ;;  %v2810_v18 = vpop.permute.xlu1 %2809 }
0x169e   :  { %2568 = vadd.xlane.f32.xlu0 %v2567_v40 }
0x16a0   :  { %v4566_v38 = vpop.eup %4565 }
0x16a1   :  { %v2570_v14 = vsel %vm235_vm2, %v4566_v38, 0.0  ;;  %v2808_v22 = vpop.permute.xlu1 %2807 }
0x16a2   :  { %2571 = vadd.xlane.f32.xlu0 %v2570_v14 }
0x16b8   :  { %2729 = vrot.lane.b32.xlu0 %v5189_v3, %s4732_s26 }
0x172b   :  { %v2569_v15 = vpop.xlane.xlu0 %2568 }
0x172c   :  { %4567 = vrcp.f32 %v2569_v15 }
0x172f   :  { %v2572_v16 = vpop.xlane.xlu0 %2571 }
0x1730   :  { %4569 = vrcp.f32 %v2572_v16 }
0x1733   :  { %v2730_v21 = vpop.permute.xlu0 %2729 }
0x1736   :  { %v4568_v19 = vpop.eup %4567 }
0x1737   :  { %v2574_v45 = vmul.f32 %v4568_v19, %v4564_v13 }
0x1739   :  { %4298 = vmatmul.mubr.msk.f32.vlgmr.msra.gmra.mrb[22].mxu0 %vm235_vm2, %v2574_v45 }
0x173a   :  { %v4570_v11 = vpop.eup %4569  ;;  %4306 = vmatpush3.xpose.msk.msra.mxu0 %vm235_vm2, %v2732_v17  ;;  %4307 = vmatprep.mubr.msk.f32.mxu0 %vm4724_vm1, %v4723_v41 }
0x173b   :  { %v2576_v20 = vmul.f32 %v4570_v11, %v4566_v38  ;;  %4315 = vmatprep.subr.mxu0 %v4723_v41 }
0x173d   :  { %4303 = vmatmul.mubr.msk.f32.vlgmr.msra.gmra.mrb[32].mxu1 %vm235_vm2, %v2576_v20  ;;  %4308 = vmatmul.mubr.msk.f32.vlgmr.msra.gmra.mrb[24].mxu0 %vm235_vm2, %v2730_v21 }
0x173e   :  { %4311 = vmatpush3.xpose.msk.msra.mxu1 %vm235_vm2, %v2810_v18  ;;  %4312 = vmatprep.mubr.msk.f32.mxu1 %vm4724_vm1, %v4723_v41 }
0x173f   :  { %4320 = vmatprep.subr.mxu1 %v4723_v41  ;;  %4317 = vmatprep.mubr.msk.f32.mxu0 %vm4724_vm1, %v4723_v41 }
0x1741   :  { %4313 = vmatmul.mubr.msk.f32.vlgmr.msra.gmra.mrb[34].mxu1 %vm235_vm2, %v2808_v22 }
0x1742   :  { %4322 = vmatprep.mubr.msk.f32.mxu1 %vm4724_vm1, %v4723_v41 }
0x180c   :  { %v5283_v25 = vpop.f32.mrb[22].mxu0 }
0x180d   :  { %v4299_v27 = vpop.f32.mrb[23].mxu0 }
0x1810   :  { %v5285_v47 = vpop.f32.mrb[32].mxu1  ;;  %v2803_v29 = vpop.f32.mrb[24].mxu0 }
0x1811   :  { %v2885_v31 = vmul.f32 0.35355338, %v2803_v29  ;;  %v4304_v32 = vpop.f32.mrb[33].mxu1  ;;  %v4309_v33 = vpop.f32.mrb[25].mxu0 }
0x1813   :  { %v2887_v34 = vadd.f32 %v2885_v31, %v4914_v58 }
0x1814   :  { %v2881_v36 = vpop.f32.mrb[34].mxu1 }
0x1815   :  { %v2886_v37 = vmul.f32 0.35355338, %v2881_v36  ;;  %v4314_v43 = vpop.f32.mrb[35].mxu1  ;;  %v2889_v44 = vsel %vm235_vm2, %v2887_v34, -inf }
0x1816   :  { %2890 = vmax.xlane.f32.xlu0 %v2889_v44 }
0x1817   :  { %v2888_v48 = vadd.f32 %v2886_v37, %v4917_v62 }
0x1819   :  { %v2892_v52 = vsel %vm235_vm2, %v2888_v48, -inf }
0x181a   :  { %2893 = vmax.xlane.f32.xlu1 %v2892_v52 }
0x182b   :  { %2987 = vrot.lane.b32.xlu1 %v5187_v2, %s4733_s27 }
0x182c   :  { %2911 = vrot.lane.b32.xlu0 %v5189_v3, %s4733_s27 }
0x182f   :  { %3065 = vrot.lane.b32.xlu1 %v5189_v3, %s4734_s28 }
0x1833   :  { %3143 = vrot.lane.b32.xlu1 %v5187_v2, %s4734_s28 }
0x1837   :  { %3141 = vrot.lane.b32.xlu1 %v5187_v2, %s4735_s0 }
0x18a3   :  { %v2891_v53 = vpop.xlane.xlu0 %2890 }
0x18a4   :  { %v2895_v54 = vsub.f32 %v2887_v34, %v2891_v53 }
0x18a6   :  { %v2897_v55 = vmul.f32 1.442695, %v2895_v54 }
0x18a7   :  { %v2912_v56 = vpop.permute.xlu0 %2911  ;;  %v2894_v59 = vpop.xlane.xlu1 %2893 }
0x18a8   :  { %4571 = vpow2.f32 %v2897_v55  ;;  %v2896_v35 = vsub.f32 %v2888_v48, %v2894_v59  ;;  %4316 = vmatpush3.msra.mxu0 %v2912_v56 }
0x18a9   :  { %4325 = vmatprep.subr.mxu0 %v4723_v41 }
0x18aa   :  { %v2899_v60 = vmul.f32 1.442695, %v2896_v35  ;;  %v3975_v35 = vld [vmem:[%s5467_s5 + $0x28] sm:$0xff] }
0x18ab   :  { %v2988_v42 = vpop.permute.xlu1 %2987 }
0x18ac   :  { %4573 = vpow2.f32 %v2899_v60  ;;  %4321 = vmatpush3.msra.mxu1 %v2988_v42  ;;  %v3976_v42 = vld [vmem:[%s5467_s5 + $0x30] sm:$0xff] }
0x18ad   :  { %4330 = vmatprep.subr.mxu1 %v4723_v41 }
0x18af   :  { %v3066_v7 = vpop.permute.xlu1 %3065 }
0x18b2   :  { %v4572_v1 = vpop.eup %4571 }
0x18b3   :  { %v2901_v39 = vsel %vm235_vm2, %v4572_v1, 0.0  ;;  %v3144_v13 = vpop.permute.xlu1 %3143 }
0x18b4   :  { %2902 = vadd.xlane.f32.xlu0 %v2901_v39 }
0x18b6   :  { %v4574_v4 = vpop.eup %4573 }
0x18b7   :  { %v2904_v5 = vsel %vm235_vm2, %v4574_v4, 0.0  ;;  %v3142_v14 = vpop.permute.xlu1 %3141 }
0x18b8   :  { %2905 = vadd.xlane.f32.xlu0 %v2904_v5 }
0x18ce   :  { %3063 = vrot.lane.b32.xlu0 %v5189_v3, %s4735_s0 }
0x1941   :  { %v2903_v28 = vpop.xlane.xlu0 %2902 }
0x1942   :  { %4575 = vrcp.f32 %v2903_v28 }
0x1945   :  { %v2906_v6 = vpop.xlane.xlu0 %2905 }
0x1946   :  { %4577 = vrcp.f32 %v2906_v6 }
0x1949   :  { %v3064_v38 = vpop.permute.xlu0 %3063 }
0x194c   :  { %v4576_v8 = vpop.eup %4575 }
0x194d   :  { %v2908_v10 = vmul.f32 %v4576_v8, %v4572_v1  ;;  %v3977_v1 = vld [vmem:[%s5467_s5 + $0x38] sm:$0xff] }
0x194e   :  { %v4449_v39 = vpack.c.bf16 %v3977_v1, %v3976_v42 }
0x194f   :  { %4318 = vmatmul.mubr.msk.f32.vlgmr.msra.gmra.mrb[26].mxu0 %vm235_vm2, %v2908_v10 }
0x1950   :  { %v4578_v12 = vpop.eup %4577  ;;  %4326 = vmatpush3.xpose.msk.msra.mxu0 %vm235_vm2, %v3066_v7  ;;  %4327 = vmatprep.mubr.msk.f32.mxu0 %vm4724_vm1, %v4723_v41 }
0x1951   :  { %v2910_v40 = vmul.f32 %v4578_v12, %v4574_v4  ;;  %4335 = vmatprep.subr.mxu0 %v4723_v41 }
0x1953   :  { %4323 = vmatmul.mubr.msk.f32.vlgmr.msra.gmra.mrb[36].mxu1 %vm235_vm2, %v2910_v40  ;;  %4328 = vmatmul.mubr.msk.f32.vlgmr.msra.gmra.mrb[28].mxu0 %vm235_vm2, %v3064_v38 }
0x1954   :  { %4331 = vmatpush3.xpose.msk.msra.mxu1 %vm235_vm2, %v3144_v13  ;;  %4332 = vmatprep.mubr.msk.f32.mxu1 %vm4724_vm1, %v4723_v41 }
0x1955   :  { %4340 = vmatprep.subr.mxu1 %v4723_v41  ;;  %4337 = vmatprep.mubr.msk.f32.mxu0 %vm4724_vm1, %v4723_v41 }
0x1957   :  { %4333 = vmatmul.mubr.msk.f32.vlgmr.msra.gmra.mrb[38].mxu1 %vm235_vm2, %v3142_v14 }
0x1958   :  { %4342 = vmatprep.mubr.msk.f32.mxu1 %vm4724_vm1, %v4723_v41 }
0x1a22   :  { %v2983_v15 = vpop.f32.mrb[26].mxu0 }
0x1a23   :  { %v4319_v16 = vpop.f32.mrb[27].mxu0 }
0x1a26   :  { %v3059_v17 = vpop.f32.mrb[36].mxu1  ;;  %v3137_v19 = vpop.f32.mrb[28].mxu0 }
0x1a27   :  { %v3219_v45 = vmul.f32 0.35355338, %v3137_v19  ;;  %v4324_v11 = vpop.f32.mrb[37].mxu1  ;;  %v4329_v18 = vpop.f32.mrb[29].mxu0 }
0x1a29   :  { %v3221_v20 = vadd.f32 %v3219_v45, %v4914_v58 }
0x1a2a   :  { %v3215_v21 = vpop.f32.mrb[38].mxu1 }
0x1a2b   :  { %v3220_v22 = vmul.f32 0.35355338, %v3215_v21  ;;  %v4334_v27 = vpop.f32.mrb[39].mxu1  ;;  %v3223_v29 = vsel %vm235_vm2, %v3221_v20, -inf }
0x1a2c   :  { %3224 = vmax.xlane.f32.xlu0 %v3223_v29 }
0x1a2d   :  { %v3222_v31 = vadd.f32 %v3220_v22, %v4917_v62 }
0x1a2f   :  { %v3226_v32 = vsel %vm235_vm2, %v3222_v31, -inf }
0x1a30   :  { %3227 = vmax.xlane.f32.xlu1 %v3226_v32 }
0x1a41   :  { %3321 = vrot.lane.b32.xlu1 %v5187_v2, %s4736_s16 }
0x1a45   :  { %3399 = vrot.lane.b32.xlu1 %v5283_v25, %s4721_s14 }
0x1a49   :  { %3401 = vrot.lane.b32.xlu1 %v5285_v47, %s4721_s14 }
0x1a4d   :  { %3409 = vrot.lane.b32.xlu1 %v3059_v17, %s4737_s3 }
0x1ab9   :  { %v3225_v58 = vpop.xlane.xlu0 %3224 }
0x1aba   :  { %v3229_v33 = vsub.f32 %v3221_v20, %v3225_v58 }
0x1abc   :  { %v3231_v34 = vmul.f32 1.442695, %v3229_v33 }
0x1abd   :  { %v3228_v36 = vpop.xlane.xlu1 %3227 }
0x1abe   :  { %4579 = vpow2.f32 %v3231_v34  ;;  %v3230_v62 = vsub.f32 %v3222_v31, %v3228_v36 }
0x1ac0   :  { %v3233_v37 = vmul.f32 1.442695, %v3230_v62 }
0x1ac1   :  { %v3322_v43 = vpop.permute.xlu1 %3321 }
0x1ac2   :  { %4581 = vpow2.f32 %v3233_v37  ;;  %4341 = vmatpush3.msra.mxu1 %v3322_v43  ;;  %v3981_v37 = vld [vmem:[%s5468_s6 + $0x28] sm:$0xff] }
0x1ac5   :  { %v3400_v7 = vpop.permute.xlu1 %3399 }
0x1ac6   :  { %v3421_v12 = vsel %vm235_vm2, %v5243_v46, %v3400_v7  ;;  %v3435_v46 = vrot.slane %v5183_v0, %v4864_v30  ;;  %v3988_v7 = vld [vmem:[%s5469_s7 + $0x50] sm:$0xff] }
0x1ac8   :  { %v4580_v44 = vpop.eup %4579 }
0x1ac9   :  { %v3235_v2 = vsel %vm235_vm2, %v4580_v44, 0.0  ;;  %v3402_v8 = vpop.permute.xlu1 %3401 }
0x1aca   :  { %3236 = vadd.xlane.f32.xlu0 %v3235_v2  ;;  %v3983_v2 = vld [vmem:[%s5468_s6 + $0x38] sm:$0xff] }
0x1acc   :  { %v4582_v25 = vpop.eup %4581 }
0x1acd   :  { %v3238_v48 = vsel %vm235_vm2, %v4582_v25, 0.0  ;;  %v3410_v13 = vpop.permute.xlu1 %3409 }
0x1ace   :  { %3239 = vadd.xlane.f32.xlu0 %v3238_v48 }
0x1ae4   :  { %3245 = vrot.lane.b32.xlu0 %v5189_v3, %s4736_s16  ;;  %v3974_v3 = vld [vmem:[%s5467_s5 + $0x20] sm:$0xff] }
0x1ae5   :  { %v4445_v60 = vpack.c.bf16 %v3975_v35, %v3974_v3  ;;  %v3554_v35 = vrot.slane %v5183_v0, %v1734_v24  ;;  %v3987_v24 = vld [vmem:[%s5469_s7 + $0x48] sm:$0xff] }
0x1ae8   :  { %3407 = vrot.lane.b32.xlu0 %v2983_v15, %s4737_s3  ;;  %v3422_v15 = vsel %vm235_vm2, %v5245_v49, %v3402_v8  ;;  %v3989_v8 = vld [vmem:[%s5469_s7 + $0x58] sm:$0xff] }
0x1ae9   :  { %v3424_v16 = vsel %vm1603_vm4, %v3422_v15, %v3410_v13  ;;  %v3565_v15 = vrot.slane %v5183_v0, %v1744_v57  ;;  %v3669_v57 = vrot.slane %v5183_v0, %v1847_v9 }
0x1b57   :  { %v3237_v47 = vpop.xlane.xlu0 %3236 }
0x1b58   :  { %4583 = vrcp.f32 %v3237_v47 }
0x1b5b   :  { %v3240_v52 = vpop.xlane.xlu0 %3239 }
0x1b5c   :  { %4585 = vrcp.f32 %v3240_v52 }
0x1b5f   :  { %v3246_v53 = vpop.permute.xlu0 %3245 }
0x1b60   :  { %4336 = vmatpush3.msra.mxu0 %v3246_v53 }
0x1b61   :  { %4446 = vmatprep.subr.bf16.mxu0 %v4445_v60 }
0x1b62   :  { %v4584_v54 = vpop.eup %4583 }
0x1b63   :  { %v3242_v55 = vmul.f32 %v4584_v54, %v4580_v44  ;;  %v3408_v10 = vpop.permute.xlu0 %3407  ;;  %v3982_v44 = vld [vmem:[%s5468_s6 + $0x30] sm:$0xff] }
0x1b64   :  { %v3423_v40 = vsel %vm1603_vm4, %v3421_v12, %v3408_v10  ;;  %v3990_v10 = vld [vmem:[%s5469_s7 + $0x60] sm:$0xff]  ;;  %v3991_v12 = vld [vmem:[%s5469_s7 + $0x68] sm:$0xff] }
0x1b65   :  { %4338 = vmatmul.mubr.msk.f32.vlgmr.msra.gmra.mrb[30].mxu0 %vm235_vm2, %v3242_v55  ;;  %v4469_v13 = vpack.c.bf16 %v3991_v12, %v3990_v10 }
0x1b66   :  { %v4586_v56 = vpop.eup %4585  ;;  %4448 = vmatpush3.bf16.msra.mxu0 %v4445_v60 }
0x1b67   :  { %v3244_v59 = vmul.f32 %v4586_v56, %v4582_v25  ;;  %4450 = vmatprep.subr.bf16.mxu0 %v4449_v39  ;;  %v4457_v25 = vpack.c.bf16 %v3983_v2, %v3982_v44  ;;  %v3548_v56 = vrot.slane %v5183_v0, %v5098_v23 }
0x1b69   :  { %4343 = vmatmul.mubr.msk.f32.vlgmr.msra.gmra.mrb[40].mxu1 %vm235_vm2, %v3244_v59 }
0x1b6a   :  { %4452 = vmatpush3.bf16.msra.mxu0 %v4449_v39 }
0x1c38   :  { %v3317_v4 = vpop.f32.mrb[30].mxu0 }
0x1c39   :  { %3415 = vrot.lane.b32.xlu0 %v3317_v4, %s4738_s18  ;;  %v4339_v5 = vpop.f32.mrb[31].mxu0 }
0x1c3c   :  { %v3393_v28 = vpop.f32.mrb[40].mxu1 }
0x1c3d   :  { %3417 = vrot.lane.b32.xlu1 %v3393_v28, %s4738_s18  ;;  %v4344_v6 = vpop.f32.mrb[41].mxu1  ;;  %v3986_v28 = vld [vmem:[%s5469_s7 + $0x40] sm:$0xff] }
0x1c3e   :  { %v4461_v6 = vpack.c.bf16 %v3987_v24, %v3986_v28  ;;  %v3782_v28 = vrot.slane %v5183_v0, %v1961_v50 }
0x1c40   :  { %4462 = vmatprep.subr.bf16.mxu0 %v4461_v6 }
0x1cab   :  { %v3416_v38 = vpop.permute.xlu0 %3415 }
0x1cac   :  { %v3425_v14 = vsel %vm1606_vm3, %v3423_v40, %v3416_v38  ;;  %v3992_v40 = vld [vmem:[%s5469_s7 + $0x70] sm:$0xff]  ;;  %v3993_v38 = vld [vmem:[%s5469_s7 + $0x78] sm:$0xff]  ;;  %s4740_s7 = smov [#allocation8]  }
0x1cad   :  { %4353 = vmatprep.mubr.msk.f32.mxu0 %vm78_vm0, %v3425_v14  ;;  %v4473_v14 = vpack.c.bf16 %v3993_v38, %v3992_v40  ;;  %s3886_s22 = sshll.u32 %s4740_s7, 4  ;;  %s3887_s22 = int_to_ptr.vmem [resolvable:$true] %s3886_s22 }
0x1cae   :  { %s4666_s23 = scalar_lea.vmem %s3887_s22, 32  ;;  %p4671_p11 = scmp.lt.s32.totalorder %s3887_s22, %s3887_s22 }
0x1caf   :  { %v3418_v17 = vpop.permute.xlu1 %3417  ;;  %p4667_p10 = scmp.ne.s32.totalorder %s3887_s22, %s4666_s23  ;;  %p4672_p12 = scmp.lt.s32.totalorder %s4666_s23, %s4666_s23 }
0x1cb0   :  { %v3426_v19 = vsel %vm1606_vm3, %v3424_v16, %v3418_v17 }
0x1cb1   :  { %4354 = vmatmul.mubr.msk.f32.vlgmr.msra.gmra.mrb[32].mxu0 %vm78_vm0, %v3426_v19  ;;  %p4673_p13 = por %p4672_p12, %p4671_p11 }
0x1cb2   :  { %4464 = vmatpush3.bf16.msra.mxu0 %v4461_v6 }
0x1cb3   :  { %p4674_p0 = pnand %p4673_p13, %p4667_p10 }
0x1d84   :  { %v4355_v45 = vpop.f32.mrb[32].mxu0 }
0x1d85   :  { %v3514_v11 = vadd.f32 %v4355_v45, %v3435_v46  ;;  %v3508_v18 = vpop.f32.mrb[33].mxu0 }
0x1d86   :  { %v3509_v20 = vadd.f32 %v3508_v18, %v3435_v46 }
0x1d87   :  { %v3518_v21 = vadd.f32 %v3514_v11, %v5172_v63 }
0x1d88   :  { %v3517_v22 = vadd.f32 %v3509_v20, %v5170_v61  ;;  %v3980_v61 = vld [vmem:[%s5468_s6 + $0x20] sm:$0xff] }
0x1d89   :  { %v3522_v49 = vsel %vm78_vm0, %v3518_v21, 0.0  ;;  %v4453_v43 = vpack.c.bf16 %v3981_v37, %v3980_v61 }
0x1d8a   :  { %3523 = vadd.xlane.f32.xlu1 %v3522_v49  ;;  %v3519_v27 = vsel %vm78_vm0, %v3517_v22, 0.0 }
0x1d8b   :  { %3520 = vadd.xlane.f32.xlu0 %v3519_v27  ;;  %4454 = vmatprep.subr.bf16.mxu1 %v4453_v43 }
0x1d8c   :  { %4456 = vmatpush3.bf16.msra.mxu1 %v4453_v43 }
0x1d8d   :  { %4458 = vmatprep.subr.bf16.mxu1 %v4457_v25 }
0x1d90   :  { %4460 = vmatpush3.bf16.msra.mxu1 %v4457_v25 }
0x1e17   :  { %v3524_v29 = vpop.xlane.xlu1 %3523 }
0x1e18   :  { %v3526_v31 = vmul.f32 0.03125, %v3524_v29  ;;  %v3521_v32 = vpop.xlane.xlu0 %3520 }
0x1e19   :  { %v3525_v58 = vmul.f32 0.03125, %v3521_v32 }
0x1e1a   :  { %v3528_v33 = vsub.f32 %v3518_v21, %v3526_v31 }
0x1e1b   :  { %v3527_v30 = vsub.f32 %v3517_v22, %v3525_v58 }
0x1e1c   :  { %v3530_v62 = vmul.f32 %v3528_v33, %v3528_v33 }
0x1e1d   :  { %v3529_v34 = vmul.f32 %v3527_v30, %v3527_v30 }
0x1e1e   :  { %v3534_v63 = vsel %vm78_vm0, %v3530_v62, 0.0 }
0x1e1f   :  { %v3531_v36 = vsel %vm78_vm0, %v3529_v34, 0.0 }
0x1e20   :  { %3532 = vadd.xlane.f32.xlu0 %v3531_v36 }
0x1e24   :  { %3535 = vadd.xlane.f32.xlu0 %v3534_v63 }
0x1ead   :  { %v3533_v48 = vpop.xlane.xlu0 %3532 }
0x1eae   :  { %v3537_v47 = vmul.f32 0.03125, %v3533_v48 }
0x1eb0   :  { %v3539_v52 = vadd.f32 1e-12, %v3537_v47 }
0x1eb1   :  { %v3536_v53 = vpop.xlane.xlu0 %3535 }
0x1eb2   :  { %4587 = vrsqrt.f32 %v3539_v52  ;;  %v3538_v54 = vmul.f32 0.03125, %v3536_v53  ;;  %v3799_v53 = vld [vmem:[#allocation7] sm:$0xff] }
0x1eb4   :  { %v3540_v55 = vadd.f32 1e-12, %v3538_v54  ;;  %v3800_v54 = vld [vmem:[#allocation7 + $0x8] sm:$0xff] }
0x1eb6   :  { %4589 = vrsqrt.f32 %v3540_v55  ;;  %v4478_v55 = vpack.c.bf16 %v3800_v54, %v3799_v53 }
0x1ebc   :  { %v4588_v59 = vpop.eup %4587 }
0x1ebd   :  { %v3543_v3 = vmul.f32 %v4588_v59, %v3527_v30  ;;  %v3802_v59 = vld [vmem:[#allocation7 + $0x18] sm:$0xff] }
0x1ebf   :  { %v3549_v60 = vmul.f32 %v3548_v56, %v3543_v3  ;;  %v4739_v3 = vmov 0.0|0.0  }
0x1ec0   :  { %v4590_v42 = vpop.eup %4589  ;;  %4477 = vmatprep.subr.bf16.mxu1 %v4739_v3 }
0x1ec1   :  { %v3544_v1 = vmul.f32 %v4590_v42, %v3528_v33  ;;  %v3555_v39 = vadd.f32 %v3554_v35, %v3549_v60 }
0x1ec3   :  { %v3550_v4 = vmul.f32 %v3548_v56, %v3544_v1  ;;  %4364 = vmatprep.mubr.msk.f32.mxu1 %vm78_vm0, %v3555_v39  ;;  %v3801_v56 = vld [vmem:[#allocation7 + $0x10] sm:$0xff] }
0x1ec5   :  { %v3556_v5 = vadd.f32 %v3554_v35, %v3550_v4  ;;  %v4481_v35 = vpack.c.bf16 %v3802_v59, %v3801_v56 }
0x1ec7   :  { %4365 = vmatmul.mubr.msk.f32.vlgmr.msra.gmra.mrb[42].mxu1 %vm78_vm0, %v3556_v5 }
0x1ec8   :  { %4394 = vmatprep.mubr.msk.f32.mxu1 %vm4724_vm1, %v4723_v41  ;;  %v4465_v41 = vpack.c.bf16 %v3989_v8, %v3988_v7  ;;  %4479 = vmatpush3.bf16.msra.mxu1 %v4478_v55  ;;  %v3788_v8 = vrot.slane %v5183_v0, %v1967_v51 }
0x1ec9   :  { %4480 = vmatprep.subr.bf16.mxu1 %v4739_v3 }
0x1eca   :  { %4466 = vmatprep.subr.bf16.mxu0 %v4465_v41 }
0x1ecb   :  { %4468 = vmatpush3.bf16.msra.mxu0 %v4465_v41 }
0x1ecc   :  { %4470 = vmatprep.subr.bf16.mxu0 %v4469_v13  ;;  %4482 = vmatpush3.bf16.msra.mxu1 %v4481_v35 }
0x1ecf   :  { %4472 = vmatpush3.bf16.msra.mxu0 %v4469_v13 }
0x1ed0   :  { %4474 = vmatprep.subr.bf16.mxu0 %v4473_v14 }
0x1ed3   :  { %4476 = vmatpush3.bf16.msra.mxu0 %v4473_v14 }
0x1f9a   :  { %v4366_v16 = vpop.f32.mrb[42].mxu1 }
0x1f9b   :  { %v3644_v17 = vadd.f32 %v4366_v16, %v3565_v15  ;;  %v3638_v19 = vpop.f32.mrb[43].mxu1 }
0x1f9c   :  { %v3639_v46 = vadd.f32 %v3638_v19, %v3565_v15 }
0x1f9d   :  { %v3650_v45 = vmul.f32 0.70710677, %v3644_v17  ;;  %v3648_v27 = vmul.f32 0.5, %v3644_v17 }
0x1f9e   :  { %v3649_v11 = vmul.f32 0.70710677, %v3639_v46  ;;  %v3647_v22 = vmul.f32 0.5, %v3639_v46 }
0x1f9f   :  { %4591 = verf.f32 %v3650_v45 }
0x1fa0   :  { %4593 = verf.f32 %v3649_v11 }
0x1fa9   :  { %v4592_v18 = vpop.eup %4591 }
0x1faa   :  { %v4594_v20 = vpop.eup %4593  ;;  %v3654_v21 = vadd.f32 1.0, %v4592_v18 }
0x1fab   :  { %v3653_v49 = vadd.f32 1.0, %v4594_v20 }
0x1fac   :  { %v3656_v31 = vmul.f32 %v3654_v21, %v3648_v27 }
0x1fad   :  { %v3655_v29 = vmul.f32 %v3653_v49, %v3647_v22 }
0x1faf   :  { %4383 = vmatprep.mubr.msk.f32.mxu0 %vm1849_vm5, %v3655_v29 }
0x1fb0   :  { %4384 = vmatmul.mubr.msk.f32.vlgmr.msra.gmra.mrb[34].mxu0 %vm1849_vm5, %v3656_v31 }
0x2083   :  { %v4385_v32 = vpop.f32.mrb[34].mxu0 }
0x2084   :  { %v3748_v58 = vadd.f32 %v4385_v32, %v3669_v57  ;;  %v3742_v33 = vpop.f32.mrb[35].mxu0 }
0x2085   :  { %v3743_v30 = vadd.f32 %v3742_v33, %v3669_v57 }
0x2086   :  { %v3752_v34 = vadd.f32 %v3748_v58, %v3556_v5 }
0x2087   :  { %v3751_v36 = vadd.f32 %v3743_v30, %v3555_v39 }
0x2088   :  { %v3756_v62 = vsel %vm78_vm0, %v3752_v34, 0.0 }
0x2089   :  { %3757 = vadd.xlane.f32.xlu0 %v3756_v62  ;;  %v3753_v63 = vsel %vm78_vm0, %v3751_v36, 0.0 }
0x208a   :  { %3754 = vadd.xlane.f32.xlu1 %v3753_v63 }
0x2116   :  { %v3758_v61 = vpop.xlane.xlu0 %3757 }
0x2117   :  { %v3760_v37 = vmul.f32 0.03125, %v3758_v61  ;;  %v3755_v43 = vpop.xlane.xlu1 %3754 }
0x2118   :  { %v3759_v44 = vmul.f32 0.03125, %v3755_v43 }
0x2119   :  { %v3762_v2 = vsub.f32 %v3752_v34, %v3760_v37 }
0x211a   :  { %v3761_v25 = vsub.f32 %v3751_v36, %v3759_v44 }
0x211b   :  { %v3764_v48 = vmul.f32 %v3762_v2, %v3762_v2 }
0x211c   :  { %v3763_v9 = vmul.f32 %v3761_v25, %v3761_v25 }
0x211d   :  { %v3768_v47 = vsel %vm78_vm0, %v3764_v48, 0.0 }
0x211e   :  { %3769 = vadd.xlane.f32.xlu0 %v3768_v47  ;;  %v3765_v52 = vsel %vm78_vm0, %v3763_v9, 0.0 }
0x211f   :  { %3766 = vadd.xlane.f32.xlu1 %v3765_v52 }
0x21ab   :  { %v3770_v60 = vpop.xlane.xlu0 %3769 }
0x21ac   :  { %v3772_v42 = vmul.f32 0.03125, %v3770_v60  ;;  %v3767_v1 = vpop.xlane.xlu1 %3766 }
0x21ad   :  { %v3771_v39 = vmul.f32 0.03125, %v3767_v1 }
0x21ae   :  { %v3774_v4 = vadd.f32 1e-12, %v3772_v42 }
0x21af   :  { %v3773_v5 = vadd.f32 1e-12, %v3771_v39 }
0x21b0   :  { %4595 = vrsqrt.f32 %v3774_v4 }
0x21b1   :  { %4597 = vrsqrt.f32 %v3773_v5 }
0x21ba   :  { %v4596_v24 = vpop.eup %4595 }
0x21bb   :  { %v4598_v6 = vpop.eup %4597  ;;  %v3778_v7 = vmul.f32 %v4596_v24, %v3762_v2 }
0x21bc   :  { %v3777_v41 = vmul.f32 %v4598_v6, %v3761_v25 }
0x21bd   :  { %v3784_v10 = vmul.f32 %v3782_v28, %v3778_v7 }
0x21be   :  { %v3783_v12 = vmul.f32 %v3782_v28, %v3777_v41 }
0x21bf   :  { %v3790_v13 = vadd.f32 %v3788_v8, %v3784_v10 }
0x21c0   :  { %v3789_v40 = vadd.f32 %v3788_v8, %v3783_v12 }
0x21c1   :  { %v3793_v38 = vrot.slane %v3790_v13, 7 }
0x21c3   :  { %v3795_v14 = vsel %vm3794_vm6, %v3793_v38, %v3789_v40 }
0x21c4   :  { %4395 = vmatmul.mubr.msk.f32.vlgmr.msra.gmra.mrb[44].mxu1 %vm78_vm0, %v3795_v14  ;;  %3798 = vst.msk [vmem:[#allocation8] sm:$0x3] %vm3797_vm7, %v3795_v14 }
0x21c5   :  { %4677 = shalt.err (!%p4674_p0)
}
0x21c6   :  { %s4678_s5 = scalar_lea.hbm %s5471_s9, 32 }
0x21c7   :  { %p4679_p1 = scmp.ne.s32.totalorder %s5471_s9, %s4678_s5  ;;  %p4682_p2 = scmp.lt.u32.totalorder %s4678_s5, %s5471_s9 }
0x21c9   :  { %p4684_p3 = pnand %p4682_p2, %p4679_p1 }
0x21cb   :  { %4687 = shalt.err (!%p4684_p3)
}
0x21cc   :  { %3889 = dma.vmem_to_hbm [thread:$0]  %s3887_s22, 32, %s5471_s9, [#allocation4]   ;;  %v4599_v26 = vld [vmem:[#allocation5] sm:$0x7] }
0x21cd   :  { %v3806_v50 = vrot.slane %v4599_v26, %v5098_v23  ;;  %s4741_s18 = smov [#allocation9]  }
0x21ce   :  { %s3896_s6 = sshll.u32 %s4741_s18, 4  ;;  %s3897_s6 = int_to_ptr.vmem [resolvable:$true] %s3896_s6 }
0x21cf   :  { %s4688_s30 = scalar_lea.vmem %s3897_s6, 32  ;;  %p4693_p5 = scmp.lt.s32.totalorder %s3897_s6, %s3897_s6 }
0x21d0   :  { %p4689_p4 = scmp.ne.s32.totalorder %s3897_s6, %s4688_s30  ;;  %p4694_p6 = scmp.lt.s32.totalorder %s4688_s30, %s4688_s30 }
0x21d2   :  { %p4695_p7 = por %p4694_p6, %p4693_p5 }
0x21d4   :  { %p4696_p8 = pnand %p4695_p7, %p4689_p4 }
0x2297   :  { %v3875_v51 = vpop.f32.mrb[44].mxu1 }
0x2298   :  { %v3876_v0 = vadd.f32 %v3875_v51, %v3806_v50  ;;  %v4396_v15 = vpop.f32.mrb[45].mxu1 }
0x229a   :  { %3879 = vst [vmem:[#allocation9] sm:$0x3] %v3876_v0 }
0x229b   :  { %4699 = shalt.err (!%p4696_p8)
}
0x229c   :  { %s4700_s9 = scalar_lea.hbm %s5472_s10, 32 }
0x229d   :  { %p4701_p9 = scmp.ne.s32.totalorder %s5472_s10, %s4700_s9  ;;  %p4704_p10 = scmp.lt.u32.totalorder %s4700_s9, %s5472_s10 }
0x229f   :  { %p4706_p11 = pnand %p4704_p10, %p4701_p9 }
0x22a1   :  { %4709 = shalt.err (!%p4706_p11)
}
0x22a2   :  { %3899 = dma.vmem_to_hbm [thread:$0]  %s3897_s6, 32, %s5472_s10, [#allocation10]  }
0x22a3   :  { %4714 = dma.done.wait [#allocation4], 32  }
0x22a4   :  { %4715 = vsyncadd [#allocation4], 4294967264 }
0x22a5   :  { %4716 = dma.done.wait [#allocation10], 32  }
0x22a6   :  { %4717 = vsyncadd [#allocation10], 4294967264 }
0x22a7   :  { %3906 = vsyncpa [#allocation3], 1 }
0x22a8   :  { %3907 = vsyncpa [#allocation6], 1 }
0x22a9   :  { %3908 = vsyncpa [#allocation4], 1 }
0x22aa   :  { %3909 = vsyncpa [#allocation10], 1 }

</bundles_post_ra>
